<compile_context>
chip_gen: v7x
topology: tpu7x:2x2x1
jax: 0.10.0
libtpu: 0.0.40
codegen_flags: <defaults>
</compile_context>

<pallas_src>
import functools

import jax
import jax.numpy as jnp
from jax.experimental import pallas as pl
from jax.experimental.pallas import tpu as pltpu


def _silu(x):
    return x * jax.nn.sigmoid(x)


def _round_up(x, m):
    return ((x + m - 1) // m) * m


# ------------------------------ Pallas kernel ------------------------------ #

def _gnn_kernel(h_in_ref, row_c_ref, col_c_ref, row_r_ref, ea_ref, emask_ref,
                nmask_ref, inv_denom_ref,
                w1s_ref, w1t_ref, w1e_ref, b1_ref,
                w2_ref, b2_ref,
                w3_ref, b3_ref,
                w4_ref, b4_ref,
                h_ref,
                agg_ref, hw_ref,
                *, ea_feats):
    """Grid = (n_layers, n_edge_tiles); both axes 'arbitrary' (sequential)."""
    layer = pl.program_id(0)
    etile = pl.program_id(1)
    last_etile = pl.num_programs(1) - 1

    n_pad = h_ref.shape[0]       # padded node count
    te = row_c_ref.shape[0]      # edges per tile

    # Initialize the resident node state from the embedded input (once).
    @pl.when((layer == 0) & (etile == 0))
    def _():
        h_ref[...] = h_in_ref[...]

    # Start of layer: zero the accumulator and hoist the per-layer node
    # projections (h @ W1_src, h @ W1_dst) out of the edge-tile loop.
    @pl.when(etile == 0)
    def _():
        agg_ref[...] = jnp.zeros_like(agg_ref)
        h_bf = h_ref[...].astype(jnp.bfloat16)
        hw_ref[...] = jnp.concatenate(
            [jnp.dot(h_bf, w1s_ref[...], preferred_element_type=jnp.float32),
             jnp.dot(h_bf, w1t_ref[...], preferred_element_type=jnp.float32)],
            axis=0).astype(jnp.bfloat16)                          # [2N, H]

    # ----- per-edge-tile work -----
    # Combined gather one-hot [TE, 2N]: lanes [0, N) select the source node
    # (row id), lanes [N, 2N) select the target node (col id).  One K=2N MXU
    # matmul against the pre-projected scratch replaces 2 gathers + 2
    # TExHxH projections.
    iota2 = jax.lax.broadcasted_iota(jnp.int32, (te, 2 * n_pad), 1)
    hit = (iota2 == row_c_ref[...]) | (iota2 == (col_c_ref[...] + n_pad))
    gath_oh = jnp.where(hit, 1.0, 0.0).astype(jnp.bfloat16)

    z = jnp.dot(gath_oh, hw_ref[...], preferred_element_type=jnp.float32)
    z = z + b1_ref[...]
    if ea_feats > 0:
        if ea_feats <= 8:
            # A K=ea_pad matmul runs the MXU at <7% utilization: rank-1 VPU
            # MACs over the (few) real edge-attr features are cheaper.
            ea = ea_ref[...]
            for j in range(ea_feats):
                z = z + ea[:, j:j + 1] * w1e_ref[j:j + 1, :]
        else:
            z = z + jnp.dot(ea_ref[...].astype(jnp.bfloat16),
                            w1e_ref[...].astype(jnp.bfloat16),
                            preferred_element_type=jnp.float32)
    m = _silu(z)
    m = _silu(jnp.dot(m.astype(jnp.bfloat16), w2_ref[...],
                      preferred_element_type=jnp.float32) + b2_ref[...])
    # Padded edges have edge_mask == 0, so they contribute nothing below.
    edge_feat = (m * emask_ref[...]).astype(jnp.bfloat16)         # [TE, H]

    # unsorted_segment_sum over row ids: one-hot built directly in [N, TE]
    # orientation -> plain dim-1 contraction, no transposed operand.
    iota_n = jax.lax.broadcasted_iota(jnp.int32, (n_pad, te), 0)
    scat_oh = jnp.where(iota_n == row_r_ref[...], 1.0, 0.0).astype(jnp.bfloat16)
    agg_ref[...] += jnp.dot(scat_oh, edge_feat,
                            preferred_element_type=jnp.float32)   # [N, H]

    # End of layer: node MLP + residual + node mask, update resident h.
    @pl.when(etile == last_etile)
    def _():
        h = h_ref[...]
        aggn = agg_ref[...] * inv_denom_ref[...]
        # [h | agg] against stacked [w3x; w3a]: K = 2H fills the 256-deep MXU.
        hx = jnp.concatenate(
            [h.astype(jnp.bfloat16), aggn.astype(jnp.bfloat16)], axis=-1)
        n_out = _silu(jnp.dot(hx, w3_ref[...],
                              preferred_element_type=jnp.float32) + b3_ref[...])
        n_out = jnp.dot(n_out.astype(jnp.bfloat16), w4_ref[...],
                        preferred_element_type=jnp.float32) + b4_ref[...]
        h_ref[...] = (h + n_out) * nmask_ref[...]


# ------------------------------ Model wrapper ------------------------------ #

def init_params(key, in_node_nf, in_edge_nf, hidden_nf, out_node_nf, n_layers):
    def lin(k, fan_in, fan_out):
        kw, kb = jax.random.split(k)
        scale = 0.1
        return (scale * jax.random.normal(kw, (fan_in, fan_out), jnp.float32),
                scale * jax.random.normal(kb, (fan_out,), jnp.float32))

    keys = jax.random.split(key, 2 + n_layers)
    params = {}
    params['emb_w'], params['emb_b'] = lin(keys[0], in_node_nf, hidden_nf)
    params['out_w'], params['out_b'] = lin(keys[1], hidden_nf, out_node_nf)
    params['layers'] = []
    for i in range(n_layers):
        k1, k2, k3, k4 = jax.random.split(keys[2 + i], 4)
        # edge_mlp L1 weight split into source / target / edge_attr blocks.
        w1s, _ = lin(k1, hidden_nf, hidden_nf)
        w1t, b1 = lin(jax.random.fold_in(k1, 1), hidden_nf, hidden_nf)
        w1e, _ = lin(jax.random.fold_in(k1, 2), in_edge_nf, hidden_nf)
        w2, b2 = lin(k2, hidden_nf, hidden_nf)
        # node_mlp L1 weight split into x / agg blocks.
        w3x, _ = lin(k3, hidden_nf, hidden_nf)
        w3a, b3 = lin(jax.random.fold_in(k3, 1), hidden_nf, hidden_nf)
        w4, b4 = lin(k4, hidden_nf, hidden_nf)
        params['layers'].append(dict(w1s=w1s, w1t=w1t, w1e=w1e, b1=b1,
                                     w2=w2, b2=b2,
                                     w3x=w3x, w3a=w3a, b3=b3,
                                     w4=w4, b4=b4))
    return params


def gnn_forward(params, h, edges, edge_attr=None, node_mask=None,
                edge_mask=None, normalization_factor=1.0,
                aggregation_method='sum', tile_e=1024):
    row, col = edges
    n_nodes = h.shape[0]
    n_edges = row.shape[0]
    hidden = params['emb_w'].shape[1]
    n_layers = len(params['layers'])
    in_edge_nf = params['layers'][0]['w1e'].shape[0]

    if edge_attr is None:
        ea_feats = 0
        edge_attr = jnp.zeros((n_edges, max(in_edge_nf, 1)), jnp.float32)
    else:
        ea_feats = edge_attr.shape[1]
    ea = edge_attr.shape[1]

    # Padded sizes: hidden -> lane-dense (128), edge tiles -> 128 lanes (row
    # ids are also streamed lane-major), nodes -> sublane multiples.
    n_pad = _round_up(n_nodes, 8)
    h_pad = _round_up(hidden, 128)
    ea_pad = _round_up(max(ea, in_edge_nf, 1), 8)
    tile_e = max(128, _round_up(min(tile_e, _round_up(n_edges, 128)), 128))
    e_pad = _round_up(n_edges, tile_e)
    n_tiles_e = e_pad // tile_e

    def pad2(x, r, c, dtype=jnp.float32):
        x = x.astype(dtype)
        return jnp.pad(x, ((0, r - x.shape[0]), (0, c - x.shape[1])))

    # In-embedding (tiny) done in plain XLA, then zero-padded.
    h0 = h.astype(jnp.float32) @ params['emb_w'] + params['emb_b']
    h0 = pad2(h0, n_pad, h_pad)

    row_i = row.astype(jnp.int32)
    col_i = col.astype(jnp.int32)
    row_c = jnp.pad(row_i, (0, e_pad - n_edges)).reshape(e_pad, 1)
    col_c = jnp.pad(col_i, (0, e_pad - n_edges)).reshape(e_pad, 1)
    row_r = jnp.pad(row_i, (0, e_pad - n_edges)).reshape(1, e_pad)
    ea_p = pad2(edge_attr, e_pad, ea_pad)

    if edge_mask is None:
        em = jnp.ones((n_edges, 1), jnp.float32)
    else:
        em = edge_mask.reshape(n_edges, 1).astype(jnp.float32)
    em_p = jnp.pad(em, ((0, e_pad - n_edges), (0, 0)))     # padded edges -> 0

    if node_mask is None:
        nm = jnp.ones((n_nodes, 1), jnp.float32)
    else:
        nm = node_mask.reshape(n_nodes, 1).astype(jnp.float32)
    # Zero-pad: padded node rows stay exactly zero through all layers.
    nm_p = jnp.pad(nm, ((0, n_pad - n_nodes), (0, 0)))

    # Aggregation denominator is layer-invariant -> hoisted out of the kernel.
    # ('mean' counts all real edges, matching the PyTorch reference.)
    if aggregation_method == 'sum':
        denom = jnp.full((n_nodes,), float(normalization_factor), jnp.float32)
    elif aggregation_method == 'mean':
        denom = jnp.zeros((n_nodes,), jnp.float32).at[row_i].add(1.0)
        denom = jnp.where(denom == 0, 1.0, denom)
    else:
        raise ValueError("aggregation_method must be 'sum' or 'mean'")
    inv_denom = jnp.pad(1.0 / denom, (0, n_pad - n_nodes),
                        constant_values=1.0).reshape(n_pad, 1)

    # Stack per-layer weights as [L, ., .]; matmul operands bf16, biases f32.
    def stack_w(name, rows, dtype=jnp.bfloat16):
        return jnp.stack([pad2(p[name], rows, h_pad)
                          for p in params['layers']]).astype(dtype)

    def stack_b(name):
        return jnp.stack([jnp.pad(p[name].astype(jnp.float32),
                                  (0, h_pad - hidden))
                          for p in params['layers']]).reshape(n_layers, 1, h_pad)

    w1s = stack_w('w1s', h_pad)
    w1t = stack_w('w1t', h_pad)
    w1e = stack_w('w1e', ea_pad, jnp.float32)            # used as VPU rank-1
    w2 = stack_w('w2', h_pad)
    w4 = stack_w('w4', h_pad)
    # node_mlp L1: stacked [w3x; w3a] so [h | agg] needs a single K=2H matmul.
    w3 = jnp.stack([jnp.concatenate([pad2(p['w3x'], h_pad, h_pad),
                                     pad2(p['w3a'], h_pad, h_pad)], axis=0)
                    for p in params['layers']]).astype(jnp.bfloat16)
    b1, b2, b3, b4 = (stack_b('b1'), stack_b('b2'), stack_b('b3'), stack_b('b4'))

    et_col = lambda l, e: (e, 0)      # (tile_e, 1) / (tile_e, ea_pad) tiles
    et_row = lambda l, e: (0, e)      # (1, tile_e) lane-major row-id tile
    const2 = lambda l, e: (0, 0)
    wmap = lambda l, e: (l, 0, 0)
    w_hh = pl.BlockSpec((None, h_pad, h_pad), wmap)
    b_sp = pl.BlockSpec((None, 1, h_pad), wmap)

    # ---- VMEM budget (double-buffered inputs + resident scratch + temps) ----
    weight_bytes = (6 * h_pad * h_pad * 2 + ea_pad * h_pad * 4 + 4 * h_pad * 4)
    tile_bytes = tile_e * (4 * 4 + ea_pad * 4)
    node_bytes = 2 * n_pad * h_pad * 4 + 2 * n_pad * 4
    scratch_bytes = n_pad * h_pad * 4 + 2 * n_pad * h_pad * 2
    temp_bytes = (tile_e * 2 * n_pad * 2 + n_pad * tile_e * 2
                  + 3 * tile_e * h_pad * 4)
    footprint = 2 * (weight_bytes + tile_bytes + node_bytes) \
        + scratch_bytes + temp_bytes
    vmem_limit = int(min(max(footprint + (8 << 20), 32 << 20), 64 << 20))

    # ---- Cost estimate so XLA schedules the tiny embeddings around us ----
    flops = n_layers * (
        2 * e_pad * (2 * n_pad) * h_pad          # gather + edge-MLP L1
        + 2 * e_pad * h_pad * h_pad              # edge-MLP L2
        + 2 * n_pad * e_pad * h_pad              # scatter
        + 4 * n_pad * h_pad * h_pad              # hoisted projections
        + 2 * n_pad * (2 * h_pad) * h_pad        # node-MLP L1
        + 2 * n_pad * h_pad * h_pad)             # node-MLP L2
    transcendentals = n_layers * (2 * e_pad * h_pad + n_pad * h_pad)
    bytes_accessed = (2 * n_pad * h_pad * 4 + e_pad * (4 + ea_pad) * 4
                      + 2 * n_pad * 4 + n_layers * weight_bytes)

    kernel = functools.partial(_gnn_kernel, ea_feats=int(ea_feats))

    h_out = pl.pallas_call(
        kernel,
        out_shape=jax.ShapeDtypeStruct((n_pad, h_pad), jnp.float32),
        grid_spec=pltpu.PrefetchScalarGridSpec(
            num_scalar_prefetch=0,
            grid=(n_layers, n_tiles_e),
            in_specs=[
                pl.BlockSpec((n_pad, h_pad), const2),        # embedded h
                pl.BlockSpec((tile_e, 1), et_col),           # row ids (sublane)
                pl.BlockSpec((tile_e, 1), et_col),           # col ids (sublane)
                pl.BlockSpec((1, tile_e), et_row),           # row ids (lane)
                pl.BlockSpec((tile_e, ea_pad), et_col),      # edge_attr
                pl.BlockSpec((tile_e, 1), et_col),           # edge_mask
                pl.BlockSpec((n_pad, 1), const2),            # node_mask
                pl.BlockSpec((n_pad, 1), const2),            # 1 / denom
                w_hh, w_hh,                                  # w1s, w1t
                pl.BlockSpec((None, ea_pad, h_pad), wmap),   # w1e
                b_sp,                                        # b1
                w_hh, b_sp,                                  # w2, b2
                pl.BlockSpec((None, 2 * h_pad, h_pad), wmap),  # w3 = [w3x;w3a]
                b_sp,                                        # b3
                w_hh, b_sp,                                  # w4, b4
            ],
            out_specs=pl.BlockSpec((n_pad, h_pad), const2),
            scratch_shapes=[pltpu.VMEM((n_pad, h_pad), jnp.float32),      # agg
                            pltpu.VMEM((2 * n_pad, h_pad), jnp.bfloat16)],  # hW
        ),
        compiler_params=pltpu.CompilerParams(
            dimension_semantics=("arbitrary", "arbitrary"),
            vmem_limit_bytes=vmem_limit),
        cost_estimate=pl.CostEstimate(flops=int(flops),
                                      transcendentals=int(transcendentals),
                                      bytes_accessed=int(bytes_accessed)),
    )(h0, row_c, col_c, row_r, ea_p, em_p, nm_p, inv_denom,
      w1s, w1t, w1e, b1, w2, b2, w3, b3, w4, b4)

    # Out-embedding (tiny) left to XLA; slice away padding first.
    out = h_out[:n_nodes, :hidden] @ params['out_w'] + params['out_b']
    if node_mask is not None:
        out = out * nm
    return out


# ------------------------- Pure-JAX reference check ------------------------ #

def gnn_reference(params, h, edges, edge_attr, node_mask=None, edge_mask=None,
                  normalization_factor=1.0, aggregation_method='sum'):
    row, col = edges
    n = h.shape[0]
    h = h @ params['emb_w'] + params['emb_b']
    for p in params['layers']:
        source, target = h[row], h[col]
        m = _silu(source @ p['w1s'] + target @ p['w1t']
                  + edge_attr @ p['w1e'] + p['b1'])
        m = _silu(m @ p['w2'] + p['b2'])
        if edge_mask is not None:
            m = m * edge_mask.reshape(-1, 1)
        agg = jnp.zeros((n, m.shape[1]), m.dtype).at[row].add(m)
        if aggregation_method == 'sum':
            agg = agg / normalization_factor
        else:
            deg = jnp.zeros((n,), h.dtype).at[row].add(1.0)
            deg = jnp.where(deg == 0, 1.0, deg)
            agg = agg / deg[:, None]
        out = _silu(h @ p['w3x'] + agg @ p['w3a'] + p['b3']) @ p['w4'] + p['b4']
        h = h + out
        if node_mask is not None:
            h = h * node_mask.reshape(-1, 1)
    h = h @ params['out_w'] + params['out_b']
    if node_mask is not None:
        h = h * node_mask.reshape(-1, 1)
    return h


# ---------------------------------- main ----------------------------------- #

if __name__ == "__main__":
    key = jax.random.PRNGKey(0)

    # Small synthetic graph: fully connected (no self loops).
    N, in_node_nf, in_edge_nf, hidden_nf, n_layers = 8, 6, 2, 32, 4
    rows, cols = [], []
    for i in range(N):
        for j in range(N):
            if i != j:
                rows.append(i)
                cols.append(j)
    row = jnp.array(rows, dtype=jnp.int32)
    col = jnp.array(cols, dtype=jnp.int32)
    E = row.shape[0]

    k_h, k_e, k_m, k_p = jax.random.split(key, 4)
    h = jax.random.normal(k_h, (N, in_node_nf), jnp.float32)
    edge_attr = jax.random.normal(k_e, (E, in_edge_nf), jnp.float32)

    params = init_params(k_p, in_node_nf, in_edge_nf, hidden_nf,
                         out_node_nf=in_node_nf, n_layers=n_layers)

    # Test 1: 'sum' aggregation, no masks.
    out = gnn_forward(params, h, (row, col), edge_attr,
                      normalization_factor=1.0, aggregation_method='sum')
    out = jax.block_until_ready(out)
    ref = gnn_reference(params, h, (row, col), edge_attr,
                        normalization_factor=1.0, aggregation_method='sum')
    assert out.shape == (N, in_node_nf)
    assert jnp.allclose(out, ref, rtol=2e-2, atol=2e-2), (
        "mismatch (sum), max abs diff %g" % float(jnp.max(jnp.abs(out - ref))))

    # Test 2: 'mean' aggregation with node & edge masks.
    node_mask = (jax.random.uniform(k_m, (N, 1)) > 0.2).astype(jnp.float32)
    edge_mask = (jax.random.uniform(jax.random.fold_in(k_m, 1), (E, 1)) > 0.3
                 ).astype(jnp.float32)
    out2 = gnn_forward(params, h, (row, col), edge_attr,
                       node_mask=node_mask, edge_mask=edge_mask,
                       normalization_factor=1.0, aggregation_method='mean')
    out2 = jax.block_until_ready(out2)
    ref2 = gnn_reference(params, h, (row, col), edge_attr,
                         node_mask=node_mask, edge_mask=edge_mask,
                         normalization_factor=1.0, aggregation_method='mean')
    assert jnp.allclose(out2, ref2, rtol=2e-2, atol=2e-2), (
        "mismatch (mean), max abs diff %g" % float(jnp.max(jnp.abs(out2 - ref2))))

    print("KERNEL_OK")
</pallas_src>

<mosaic_0001>
module attributes {stable_mosaic.version = 11 : i64} {
  func.func @_gnn_kernel(%arg0: i32, %arg1: i32, %arg2: memref<8x128xf32, #tpu.memory_space<vmem>>, %arg3: memref<128x1xi32, #tpu.memory_space<vmem>>, %arg4: memref<128x1xi32, #tpu.memory_space<vmem>>, %arg5: memref<1x128xi32, #tpu.memory_space<vmem>>, %arg6: memref<128x8xf32, #tpu.memory_space<vmem>>, %arg7: memref<128x1xf32, #tpu.memory_space<vmem>>, %arg8: memref<8x1xf32, #tpu.memory_space<vmem>>, %arg9: memref<8x1xf32, #tpu.memory_space<vmem>>, %arg10: memref<1x128x128xbf16, #tpu.memory_space<vmem>>, %arg11: memref<1x128x128xbf16, #tpu.memory_space<vmem>>, %arg12: memref<1x8x128xf32, #tpu.memory_space<vmem>>, %arg13: memref<1x1x128xf32, #tpu.memory_space<vmem>>, %arg14: memref<1x128x128xbf16, #tpu.memory_space<vmem>>, %arg15: memref<1x1x128xf32, #tpu.memory_space<vmem>>, %arg16: memref<1x256x128xbf16, #tpu.memory_space<vmem>>, %arg17: memref<1x1x128xf32, #tpu.memory_space<vmem>>, %arg18: memref<1x128x128xbf16, #tpu.memory_space<vmem>>, %arg19: memref<1x1x128xf32, #tpu.memory_space<vmem>>, %arg20: memref<8x128xf32, #tpu.memory_space<vmem>>, %arg21: memref<8x128xf32, #tpu.memory_space<vmem>>, %arg22: memref<16x128xbf16, #tpu.memory_space<vmem>>) attributes {dimension_semantics = [#tpu.dimension_semantics<arbitrary>, #tpu.dimension_semantics<arbitrary>], iteration_bounds = array<i64: 4, 1>, scalar_prefetch = 0 : i64, scratch_operands = 2 : i64, tpu.core_type = #tpu.core_type<tc>, window_params = [{pipeline_mode = #tpu.pipeline_mode<synchronous>, transform_indices = @transform_0, window_bounds = array<i64: 8, 128>}, {transform_indices = @transform_1, window_bounds = array<i64: 128, 1>}, {transform_indices = @transform_2, window_bounds = array<i64: 128, 1>}, {transform_indices = @transform_3, window_bounds = array<i64: 1, 128>}, {transform_indices = @transform_4, window_bounds = array<i64: 128, 8>}, {transform_indices = @transform_5, window_bounds = array<i64: 128, 1>}, {pipeline_mode = #tpu.pipeline_mode<synchronous>, transform_indices = @transform_6, window_bounds = array<i64: 8, 1>}, {pipeline_mode = #tpu.pipeline_mode<synchronous>, transform_indices = @transform_7, window_bounds = array<i64: 8, 1>}, {transform_indices = @transform_8, window_bounds = array<i64: 1, 128, 128>}, {transform_indices = @transform_9, window_bounds = array<i64: 1, 128, 128>}, {transform_indices = @transform_10, window_bounds = array<i64: 1, 8, 128>}, {transform_indices = @transform_11, window_bounds = array<i64: 1, 1, 128>}, {transform_indices = @transform_12, window_bounds = array<i64: 1, 128, 128>}, {transform_indices = @transform_13, window_bounds = array<i64: 1, 1, 128>}, {transform_indices = @transform_14, window_bounds = array<i64: 1, 256, 128>}, {transform_indices = @transform_15, window_bounds = array<i64: 1, 1, 128>}, {transform_indices = @transform_16, window_bounds = array<i64: 1, 128, 128>}, {transform_indices = @transform_17, window_bounds = array<i64: 1, 1, 128>}, {pipeline_mode = #tpu.pipeline_mode<synchronous>, transform_indices = @transform_18, window_bounds = array<i64: 8, 128>}]} {
    %c0_i32 = arith.constant 0 : i32
    %0 = arith.cmpi eq, %arg0, %c0_i32 : i32
    %c0_i32_0 = arith.constant 0 : i32
    %1 = arith.cmpi eq, %arg1, %c0_i32_0 : i32
    %2 = arith.andi %0, %1 : i1
    %3 = arith.extui %2 : i1 to i32
    %c0_i32_1 = arith.constant 0 : i32
    %4 = arith.cmpi ne, %3, %c0_i32_1 : i32
    scf.if %4 {
      %c0_43 = arith.constant 0 : index
      %c0_44 = arith.constant 0 : index
      %82 = vector.load %arg2[%c0_43, %c0_44] : memref<8x128xf32, #tpu.memory_space<vmem>>, vector<8x128xf32>
      %c0_45 = arith.constant 0 : index
      %c0_46 = arith.constant 0 : index
      %83 = vector.load %arg20[%c0_45, %c0_46] : memref<8x128xf32, #tpu.memory_space<vmem>>, vector<8x128xf32>
      tpu.vector_store %arg20[%c0_45, %c0_46], %82 {strides = array<i32>} : memref<8x128xf32, #tpu.memory_space<vmem>>, vector<8x128xf32>,
    } else {
    }
    %c0_i32_2 = arith.constant 0 : i32
    %5 = arith.cmpi eq, %arg1, %c0_i32_2 : i32
    %6 = arith.extui %5 : i1 to i32
    %c0_i32_3 = arith.constant 0 : i32
    %7 = arith.cmpi ne, %6, %c0_i32_3 : i32
    scf.if %7 {
      %cst_43 = arith.constant 0.000000e+00 : f32
      %82 = vector.broadcast %cst_43 : f32 to vector<8x128xf32>
      %c0_44 = arith.constant 0 : index
      %c0_45 = arith.constant 0 : index
      %83 = vector.load %arg21[%c0_44, %c0_45] : memref<8x128xf32, #tpu.memory_space<vmem>>, vector<8x128xf32>
      tpu.vector_store %arg21[%c0_44, %c0_45], %82 {strides = array<i32>} : memref<8x128xf32, #tpu.memory_space<vmem>>, vector<8x128xf32>,
      %c0_46 = arith.constant 0 : index
      %c0_47 = arith.constant 0 : index
      %84 = vector.load %arg20[%c0_46, %c0_47] : memref<8x128xf32, #tpu.memory_space<vmem>>, vector<8x128xf32>
      %85 = arith.truncf %84 : vector<8x128xf32> to vector<8x128xbf16>
      %c0_48 = arith.constant 0 : index
      %c0_49 = arith.constant 0 : index
      %c0_50 = arith.constant 0 : index
      %86 = vector.load %arg10[%c0_48, %c0_49, %c0_50] : memref<1x128x128xbf16, #tpu.memory_space<vmem>>, vector<1x128x128xbf16>
      %87 = vector.shape_cast %86 : vector<1x128x128xbf16> to vector<128x128xbf16>
      %cst_51 = arith.constant dense<0.000000e+00> : vector<8x128xf32>
      %88 = tpu.matmul %85, %87, %cst_51 {dimension_numbers = #tpu.dot_dimension_numbers<[1], [0], [0], [1], [0, 0, 1, 1], [], []>} : vector<8x128xbf16>, vector<128x128xbf16>, vector<8x128xf32> -> vector<8x128xf32>
      %c0_52 = arith.constant 0 : index
      %c0_53 = arith.constant 0 : index
      %c0_54 = arith.constant 0 : index
      %89 = vector.load %arg11[%c0_52, %c0_53, %c0_54] : memref<1x128x128xbf16, #tpu.memory_space<vmem>>, vector<1x128x128xbf16>
      %90 = vector.shape_cast %89 : vector<1x128x128xbf16> to vector<128x128xbf16>
      %cst_55 = arith.constant dense<0.000000e+00> : vector<8x128xf32>
      %91 = tpu.matmul %85, %90, %cst_55 {dimension_numbers = #tpu.dot_dimension_numbers<[1], [0], [0], [1], [0, 0, 1, 1], [], []>} : vector<8x128xbf16>, vector<128x128xbf16>, vector<8x128xf32> -> vector<8x128xf32>
      %92 = tpu.concatenate %88, %91 in 0 : vector<8x128xf32>, vector<8x128xf32> -> vector<16x128xf32>
      %93 = arith.truncf %92 : vector<16x128xf32> to vector<16x128xbf16>
      %c0_56 = arith.constant 0 : index
      %c0_57 = arith.constant 0 : index
      %94 = vector.load %arg22[%c0_56, %c0_57] : memref<16x128xbf16, #tpu.memory_space<vmem>>, vector<16x128xbf16>
      tpu.vector_store %arg22[%c0_56, %c0_57], %93 {strides = array<i32>} : memref<16x128xbf16, #tpu.memory_space<vmem>>, vector<16x128xbf16>,
    } else {
    }
    %8 = tpu.iota {dimensions = array<i32: 1>} : vector<128x16xi32>
    %c0 = arith.constant 0 : index
    %c0_4 = arith.constant 0 : index
    %9 = vector.load %arg3[%c0, %c0_4] : memref<128x1xi32, #tpu.memory_space<vmem>>, vector<128x1xi32>
    %10 = vector.broadcast %9 : vector<128x1xi32> to vector<128x16xi32>
    %11 = arith.cmpi eq, %8, %10 : vector<128x16xi32>
    %c0_5 = arith.constant 0 : index
    %c0_6 = arith.constant 0 : index
    %12 = vector.load %arg4[%c0_5, %c0_6] : memref<128x1xi32, #tpu.memory_space<vmem>>, vector<128x1xi32>
    %c8_i32 = arith.constant 8 : i32
    %13 = vector.broadcast %c8_i32 : i32 to vector<128x1xi32>
    %14 = arith.addi %12, %13 : vector<128x1xi32>
    %15 = vector.broadcast %14 : vector<128x1xi32> to vector<128x16xi32>
    %16 = arith.cmpi eq, %8, %15 : vector<128x16xi32>
    %17 = arith.ori %11, %16 : vector<128x16xi1>
    %cst = arith.constant 1.000000e+00 : f32
    %cst_7 = arith.constant 0.000000e+00 : f32
    %18 = vector.broadcast %cst : f32 to vector<128x16xf32>
    %19 = vector.broadcast %cst_7 : f32 to vector<128x16xf32>
    %20 = arith.select %17, %18, %19 : vector<128x16xi1>, vector<128x16xf32>
    %21 = arith.truncf %20 : vector<128x16xf32> to vector<128x16xbf16>
    %c0_8 = arith.constant 0 : index
    %c0_9 = arith.constant 0 : index
    %22 = vector.load %arg22[%c0_8, %c0_9] : memref<16x128xbf16, #tpu.memory_space<vmem>>, vector<16x128xbf16>
    %cst_10 = arith.constant dense<0.000000e+00> : vector<128x128xf32>
    %23 = tpu.matmul %21, %22, %cst_10 {dimension_numbers = #tpu.dot_dimension_numbers<[1], [0], [0], [1], [0, 0, 1, 1], [], []>} : vector<128x16xbf16>, vector<16x128xbf16>, vector<128x128xf32> -> vector<128x128xf32>
    %c0_11 = arith.constant 0 : index
    %c0_12 = arith.constant 0 : index
    %c0_13 = arith.constant 0 : index
    %24 = vector.load %arg13[%c0_11, %c0_12, %c0_13] : memref<1x1x128xf32, #tpu.memory_space<vmem>>, vector<1x1x128xf32>
    %25 = vector.shape_cast %24 : vector<1x1x128xf32> to vector<1x128xf32>
    %26 = vector.broadcast %25 : vector<1x128xf32> to vector<128x128xf32>
    %27 = arith.addf %23, %26 : vector<128x128xf32>
    %c0_14 = arith.constant 0 : index
    %c0_15 = arith.constant 0 : index
    %28 = vector.load %arg6[%c0_14, %c0_15] : memref<128x8xf32, #tpu.memory_space<vmem>>, vector<128x8xf32>
    %29 = vector.extract_strided_slice %28 {offsets = [0, 0], sizes = [128, 1], strides = [1, 1]} : vector<128x8xf32> to vector<128x1xf32>
    %c0_16 = arith.constant 0 : index
    %c0_17 = arith.constant 0 : index
    %c0_18 = arith.constant 0 : index
    %30 = vector.load %arg12[%c0_16, %c0_17, %c0_18] : memref<1x8x128xf32, #tpu.memory_space<vmem>>, vector<1x1x128xf32>
    %31 = vector.shape_cast %30 : vector<1x1x128xf32> to vector<1x128xf32>
    %32 = vector.broadcast %29 : vector<128x1xf32> to vector<128x128xf32>
    %33 = vector.broadcast %31 : vector<1x128xf32> to vector<128x128xf32>
    %34 = arith.mulf %32, %33 : vector<128x128xf32>
    %35 = arith.addf %27, %34 : vector<128x128xf32>
    %36 = vector.extract_strided_slice %28 {offsets = [0, 1], sizes = [128, 1], strides = [1, 1]} : vector<128x8xf32> to vector<128x1xf32>
    %c0_19 = arith.constant 0 : index
    %c1 = arith.constant 1 : index
    %c0_20 = arith.constant 0 : index
    %37 = vector.load %arg12[%c0_19, %c1, %c0_20] : memref<1x8x128xf32, #tpu.memory_space<vmem>>, vector<1x1x128xf32>
    %38 = vector.shape_cast %37 : vector<1x1x128xf32> to vector<1x128xf32>
    %39 = vector.broadcast %36 : vector<128x1xf32> to vector<128x128xf32>
    %40 = vector.broadcast %38 : vector<1x128xf32> to vector<128x128xf32>
    %41 = arith.mulf %39, %40 : vector<128x128xf32>
    %42 = arith.addf %35, %41 : vector<128x128xf32>
    %43 = arith.negf %42 : vector<128x128xf32>
    %44 = math.exp %43 : vector<128x128xf32>
    %cst_21 = arith.constant 1.000000e+00 : f32
    %45 = vector.broadcast %cst_21 : f32 to vector<128x128xf32>
    %46 = arith.addf %45, %44 : vector<128x128xf32>
    %47 = arith.divf %45, %46 : vector<128x128xf32>
    %48 = arith.mulf %42, %47 : vector<128x128xf32>
    %49 = arith.truncf %48 : vector<128x128xf32> to vector<128x128xbf16>
    %c0_22 = arith.constant 0 : index
    %c0_23 = arith.constant 0 : index
    %c0_24 = arith.constant 0 : index
    %50 = vector.load %arg14[%c0_22, %c0_23, %c0_24] : memref<1x128x128xbf16, #tpu.memory_space<vmem>>, vector<1x128x128xbf16>
    %51 = vector.shape_cast %50 : vector<1x128x128xbf16> to vector<128x128xbf16>
    %cst_25 = arith.constant dense<0.000000e+00> : vector<128x128xf32>
    %52 = tpu.matmul %49, %51, %cst_25 {dimension_numbers = #tpu.dot_dimension_numbers<[1], [0], [0], [1], [0, 0, 1, 1], [], []>} : vector<128x128xbf16>, vector<128x128xbf16>, vector<128x128xf32> -> vector<128x128xf32>
    %c0_26 = arith.constant 0 : index
    %c0_27 = arith.constant 0 : index
    %c0_28 = arith.constant 0 : index
    %53 = vector.load %arg15[%c0_26, %c0_27, %c0_28] : memref<1x1x128xf32, #tpu.memory_space<vmem>>, vector<1x1x128xf32>
    %54 = vector.shape_cast %53 : vector<1x1x128xf32> to vector<1x128xf32>
    %55 = vector.broadcast %54 : vector<1x128xf32> to vector<128x128xf32>
    %56 = arith.addf %52, %55 : vector<128x128xf32>
    %57 = arith.negf %56 : vector<128x128xf32>
    %58 = math.exp %57 : vector<128x128xf32>
    %cst_29 = arith.constant 1.000000e+00 : f32
    %59 = vector.broadcast %cst_29 : f32 to vector<128x128xf32>
    %60 = arith.addf %59, %58 : vector<128x128xf32>
    %61 = arith.divf %59, %60 : vector<128x128xf32>
    %62 = arith.mulf %56, %61 : vector<128x128xf32>
    %c0_30 = arith.constant 0 : index
    %c0_31 = arith.constant 0 : index
    %63 = vector.load %arg7[%c0_30, %c0_31] : memref<128x1xf32, #tpu.memory_space<vmem>>, vector<128x1xf32>
    %64 = vector.broadcast %63 : vector<128x1xf32> to vector<128x128xf32>
    %65 = arith.mulf %62, %64 : vector<128x128xf32>
    %66 = arith.truncf %65 : vector<128x128xf32> to vector<128x128xbf16>
    %67 = tpu.iota {dimensions = array<i32: 0>} : vector<8x128xi32>
    %c0_32 = arith.constant 0 : index
    %c0_33 = arith.constant 0 : index
    %68 = vector.load %arg5[%c0_32, %c0_33] : memref<1x128xi32, #tpu.memory_space<vmem>>, vector<1x128xi32>
    %69 = vector.broadcast %68 : vector<1x128xi32> to vector<8x128xi32>
    %70 = arith.cmpi eq, %67, %69 : vector<8x128xi32>
    %cst_34 = arith.constant 1.000000e+00 : f32
    %cst_35 = arith.constant 0.000000e+00 : f32
    %71 = vector.broadcast %cst_34 : f32 to vector<8x128xf32>
    %72 = vector.broadcast %cst_35 : f32 to vector<8x128xf32>
    %73 = arith.select %70, %71, %72 : vector<8x128xi1>, vector<8x128xf32>
    %74 = arith.truncf %73 : vector<8x128xf32> to vector<8x128xbf16>
    %c0_36 = arith.constant 0 : index
    %c0_37 = arith.constant 0 : index
    %75 = vector.load %arg21[%c0_36, %c0_37] : memref<8x128xf32, #tpu.memory_space<vmem>>, vector<8x128xf32>
    %cst_38 = arith.constant dense<0.000000e+00> : vector<8x128xf32>
    %76 = tpu.matmul %74, %66, %cst_38 {dimension_numbers = #tpu.dot_dimension_numbers<[1], [0], [0], [1], [0, 0, 1, 1], [], []>} : vector<8x128xbf16>, vector<128x128xbf16>, vector<8x128xf32> -> vector<8x128xf32>
    %77 = arith.addf %75, %76 : vector<8x128xf32>
    %c0_39 = arith.constant 0 : index
    %c0_40 = arith.constant 0 : index
    %78 = vector.load %arg21[%c0_39, %c0_40] : memref<8x128xf32, #tpu.memory_space<vmem>>, vector<8x128xf32>
    tpu.vector_store %arg21[%c0_39, %c0_40], %77 {strides = array<i32>} : memref<8x128xf32, #tpu.memory_space<vmem>>, vector<8x128xf32>,
    %c0_i32_41 = arith.constant 0 : i32
    %79 = arith.cmpi eq, %arg1, %c0_i32_41 : i32
    %80 = arith.extui %79 : i1 to i32
    %c0_i32_42 = arith.constant 0 : i32
    %81 = arith.cmpi ne, %80, %c0_i32_42 : i32
    scf.if %81 {
      %c0_43 = arith.constant 0 : index
      %c0_44 = arith.constant 0 : index
      %82 = vector.load %arg20[%c0_43, %c0_44] : memref<8x128xf32, #tpu.memory_space<vmem>>, vector<8x128xf32>
      %c0_45 = arith.constant 0 : index
      %c0_46 = arith.constant 0 : index
      %83 = vector.load %arg21[%c0_45, %c0_46] : memref<8x128xf32, #tpu.memory_space<vmem>>, vector<8x128xf32>
      %c0_47 = arith.constant 0 : index
      %c0_48 = arith.constant 0 : index
      %84 = vector.load %arg9[%c0_47, %c0_48] : memref<8x1xf32, #tpu.memory_space<vmem>>, vector<8x1xf32>
      %85 = vector.broadcast %84 : vector<8x1xf32> to vector<8x128xf32>
      %86 = arith.mulf %83, %85 : vector<8x128xf32>
      %87 = arith.truncf %82 : vector<8x128xf32> to vector<8x128xbf16>
      %88 = arith.truncf %86 : vector<8x128xf32> to vector<8x128xbf16>
      %89 = tpu.concatenate %87, %88 in 1 : vector<8x128xbf16>, vector<8x128xbf16> -> vector<8x256xbf16>
      %c0_49 = arith.constant 0 : index
      %c0_50 = arith.constant 0 : index
      %c0_51 = arith.constant 0 : index
      %90 = vector.load %arg16[%c0_49, %c0_50, %c0_51] : memref<1x256x128xbf16, #tpu.memory_space<vmem>>, vector<1x256x128xbf16>
      %91 = vector.shape_cast %90 : vector<1x256x128xbf16> to vector<256x128xbf16>
      %cst_52 = arith.constant dense<0.000000e+00> : vector<8x128xf32>
      %92 = tpu.matmul %89, %91, %cst_52 {dimension_numbers = #tpu.dot_dimension_numbers<[1], [0], [0], [1], [0, 0, 1, 1], [], []>} : vector<8x256xbf16>, vector<256x128xbf16>, vector<8x128xf32> -> vector<8x128xf32>
      %c0_53 = arith.constant 0 : index
      %c0_54 = arith.constant 0 : index
      %c0_55 = arith.constant 0 : index
      %93 = vector.load %arg17[%c0_53, %c0_54, %c0_55] : memref<1x1x128xf32, #tpu.memory_space<vmem>>, vector<1x1x128xf32>
      %94 = vector.shape_cast %93 : vector<1x1x128xf32> to vector<1x128xf32>
      %95 = vector.broadcast %94 : vector<1x128xf32> to vector<8x128xf32>
      %96 = arith.addf %92, %95 : vector<8x128xf32>
      %97 = arith.negf %96 : vector<8x128xf32>
      %98 = math.exp %97 : vector<8x128xf32>
      %cst_56 = arith.constant 1.000000e+00 : f32
      %99 = vector.broadcast %cst_56 : f32 to vector<8x128xf32>
      %100 = arith.addf %99, %98 : vector<8x128xf32>
      %101 = arith.divf %99, %100 : vector<8x128xf32>
      %102 = arith.mulf %96, %101 : vector<8x128xf32>
      %103 = arith.truncf %102 : vector<8x128xf32> to vector<8x128xbf16>
      %c0_57 = arith.constant 0 : index
      %c0_58 = arith.constant 0 : index
      %c0_59 = arith.constant 0 : index
      %104 = vector.load %arg18[%c0_57, %c0_58, %c0_59] : memref<1x128x128xbf16, #tpu.memory_space<vmem>>, vector<1x128x128xbf16>
      %105 = vector.shape_cast %104 : vector<1x128x128xbf16> to vector<128x128xbf16>
      %cst_60 = arith.constant dense<0.000000e+00> : vector<8x128xf32>
      %106 = tpu.matmul %103, %105, %cst_60 {dimension_numbers = #tpu.dot_dimension_numbers<[1], [0], [0], [1], [0, 0, 1, 1], [], []>} : vector<8x128xbf16>, vector<128x128xbf16>, vector<8x128xf32> -> vector<8x128xf32>
      %c0_61 = arith.constant 0 : index
      %c0_62 = arith.constant 0 : index
      %c0_63 = arith.constant 0 : index
      %107 = vector.load %arg19[%c0_61, %c0_62, %c0_63] : memref<1x1x128xf32, #tpu.memory_space<vmem>>, vector<1x1x128xf32>
      %108 = vector.shape_cast %107 : vector<1x1x128xf32> to vector<1x128xf32>
      %109 = vector.broadcast %108 : vector<1x128xf32> to vector<8x128xf32>
      %110 = arith.addf %106, %109 : vector<8x128xf32>
      %111 = arith.addf %82, %110 : vector<8x128xf32>
      %c0_64 = arith.constant 0 : index
      %c0_65 = arith.constant 0 : index
      %112 = vector.load %arg8[%c0_64, %c0_65] : memref<8x1xf32, #tpu.memory_space<vmem>>, vector<8x1xf32>
      %113 = vector.broadcast %112 : vector<8x1xf32> to vector<8x128xf32>
      %114 = arith.mulf %111, %113 : vector<8x128xf32>
      %c0_66 = arith.constant 0 : index
      %c0_67 = arith.constant 0 : index
      %115 = vector.load %arg20[%c0_66, %c0_67] : memref<8x128xf32, #tpu.memory_space<vmem>>, vector<8x128xf32>
      tpu.vector_store %arg20[%c0_66, %c0_67], %114 {strides = array<i32>} : memref<8x128xf32, #tpu.memory_space<vmem>>, vector<8x128xf32>,
    } else {
    }
    return
  }
  func.func @transform_0(%arg0: i32, %arg1: i32) -> (i32, i32) {
    %c0_i32 = arith.constant 0 : i32
    %c0_i32_0 = arith.constant 0 : i32
    %c0_i32_1 = arith.constant 0 : i32
    return %c0_i32, %c0_i32_0 : i32, i32
  }
  func.func @transform_1(%arg0: i32, %arg1: i32) -> (i32, i32) {
    %c0_i32 = arith.constant 0 : i32
    %c0_i32_0 = arith.constant 0 : i32
    return %arg1, %c0_i32 : i32, i32
  }
  func.func @transform_2(%arg0: i32, %arg1: i32) -> (i32, i32) {
    %c0_i32 = arith.constant 0 : i32
    %c0_i32_0 = arith.constant 0 : i32
    return %arg1, %c0_i32 : i32, i32
  }
  func.func @transform_3(%arg0: i32, %arg1: i32) -> (i32, i32) {
    %c0_i32 = arith.constant 0 : i32
    %c0_i32_0 = arith.constant 0 : i32
    return %c0_i32, %arg1 : i32, i32
  }
  func.func @transform_4(%arg0: i32, %arg1: i32) -> (i32, i32) {
    %c0_i32 = arith.constant 0 : i32
    %c0_i32_0 = arith.constant 0 : i32
    return %arg1, %c0_i32 : i32, i32
  }
  func.func @transform_5(%arg0: i32, %arg1: i32) -> (i32, i32) {
    %c0_i32 = arith.constant 0 : i32
    %c0_i32_0 = arith.constant 0 : i32
    return %arg1, %c0_i32 : i32, i32
  }
  func.func @transform_6(%arg0: i32, %arg1: i32) -> (i32, i32) {
    %c0_i32 = arith.constant 0 : i32
    %c0_i32_0 = arith.constant 0 : i32
    %c0_i32_1 = arith.constant 0 : i32
    return %c0_i32, %c0_i32_0 : i32, i32
  }
  func.func @transform_7(%arg0: i32, %arg1: i32) -> (i32, i32) {
    %c0_i32 = arith.constant 0 : i32
    %c0_i32_0 = arith.constant 0 : i32
    %c0_i32_1 = arith.constant 0 : i32
    return %c0_i32, %c0_i32_0 : i32, i32
  }
  func.func @transform_8(%arg0: i32, %arg1: i32) -> (i32, i32, i32) {
    %c0_i32 = arith.constant 0 : i32
    %c0_i32_0 = arith.constant 0 : i32
    %c0_i32_1 = arith.constant 0 : i32
    return %arg0, %c0_i32, %c0_i32_0 : i32, i32, i32
  }
  func.func @transform_9(%arg0: i32, %arg1: i32) -> (i32, i32, i32) {
    %c0_i32 = arith.constant 0 : i32
    %c0_i32_0 = arith.constant 0 : i32
    %c0_i32_1 = arith.constant 0 : i32
    return %arg0, %c0_i32, %c0_i32_0 : i32, i32, i32
  }
  func.func @transform_10(%arg0: i32, %arg1: i32) -> (i32, i32, i32) {
    %c0_i32 = arith.constant 0 : i32
    %c0_i32_0 = arith.constant 0 : i32
    %c0_i32_1 = arith.constant 0 : i32
    return %arg0, %c0_i32, %c0_i32_0 : i32, i32, i32
  }
  func.func @transform_11(%arg0: i32, %arg1: i32) -> (i32, i32, i32) {
    %c0_i32 = arith.constant 0 : i32
    %c0_i32_0 = arith.constant 0 : i32
    %c0_i32_1 = arith.constant 0 : i32
    return %arg0, %c0_i32, %c0_i32_0 : i32, i32, i32
  }
  func.func @transform_12(%arg0: i32, %arg1: i32) -> (i32, i32, i32) {
    %c0_i32 = arith.constant 0 : i32
    %c0_i32_0 = arith.constant 0 : i32
    %c0_i32_1 = arith.constant 0 : i32
    return %arg0, %c0_i32, %c0_i32_0 : i32, i32, i32
  }
  func.func @transform_13(%arg0: i32, %arg1: i32) -> (i32, i32, i32) {
    %c0_i32 = arith.constant 0 : i32
    %c0_i32_0 = arith.constant 0 : i32
    %c0_i32_1 = arith.constant 0 : i32
    return %arg0, %c0_i32, %c0_i32_0 : i32, i32, i32
  }
  func.func @transform_14(%arg0: i32, %arg1: i32) -> (i32, i32, i32) {
    %c0_i32 = arith.constant 0 : i32
    %c0_i32_0 = arith.constant 0 : i32
    %c0_i32_1 = arith.constant 0 : i32
    return %arg0, %c0_i32, %c0_i32_0 : i32, i32, i32
  }
  func.func @transform_15(%arg0: i32, %arg1: i32) -> (i32, i32, i32) {
    %c0_i32 = arith.constant 0 : i32
    %c0_i32_0 = arith.constant 0 : i32
    %c0_i32_1 = arith.constant 0 : i32
    return %arg0, %c0_i32, %c0_i32_0 : i32, i32, i32
  }
  func.func @transform_16(%arg0: i32, %arg1: i32) -> (i32, i32, i32) {
    %c0_i32 = arith.constant 0 : i32
    %c0_i32_0 = arith.constant 0 : i32
    %c0_i32_1 = arith.constant 0 : i32
    return %arg0, %c0_i32, %c0_i32_0 : i32, i32, i32
  }
  func.func @transform_17(%arg0: i32, %arg1: i32) -> (i32, i32, i32) {
    %c0_i32 = arith.constant 0 : i32
    %c0_i32_0 = arith.constant 0 : i32
    %c0_i32_1 = arith.constant 0 : i32
    return %arg0, %c0_i32, %c0_i32_0 : i32, i32, i32
  }
  func.func @transform_18(%arg0: i32, %arg1: i32) -> (i32, i32) {
    %c0_i32 = arith.constant 0 : i32
    %c0_i32_0 = arith.constant 0 : i32
    %c0_i32_1 = arith.constant 0 : i32
    return %c0_i32, %c0_i32_0 : i32, i32
  }
}

</mosaic_0001>

<bundles_post_ra>
// kernel: tpu_custom_call.1
= control target key start
LH: loop header
LB: loop body
LE: loop exit
PB: predicated region body
PF: predicated region fallthrough
CT: control target
= control target key end

     0   :  { %s4800_s0 = inlined_call_operand.vmem [shape: f32[8,128], index: 0, kind: input, shape index: {}]   ;;  %s4801_s1 = inlined_call_operand.vmem [shape: s32[128,1], index: 1, kind: input, shape index: {}]   ;;  %s4802_s2 = inlined_call_operand.vmem [shape: s32[128,1], index: 2, kind: input, shape index: {}]   ;;  %s4803_s3 = inlined_call_operand.vmem [shape: s32[1,128], index: 3, kind: input, shape index: {}]   ;;  %s4804_s4 = inlined_call_operand.vmem [shape: f32[128,8], index: 4, kind: input, shape index: {}]   ;;  %s4805_s5 = inlined_call_operand.vmem [shape: f32[128,1], index: 5, kind: input, shape index: {}]   ;;  %s4806_s6 = inlined_call_operand.vmem [shape: f32[8,1], index: 6, kind: input, shape index: {}]   ;;  %s4807_s7 = inlined_call_operand.vmem [shape: f32[8,1], index: 7, kind: input, shape index: {}]   ;;  %s4808_s8 = inlined_call_operand.hbm [shape: bf16[4,128,128], index: 8, kind: input, shape index: {}]   ;;  %s4809_s9 = inlined_call_operand.hbm [shape: bf16[4,128,128], index: 9, kind: input, shape index: {}]   ;;  %s4810_s10 = inlined_call_operand.vmem [shape: f32[4,8,128], index: 10, kind: input, shape index: {}]   ;;  %s4811_s11 = inlined_call_operand.vmem [shape: f32[4,1,128], index: 11, kind: input, shape index: {}]   ;;  %s4812_s12 = inlined_call_operand.hbm [shape: bf16[4,128,128], index: 12, kind: input, shape index: {}]   ;;  %s4813_s13 = inlined_call_operand.vmem [shape: f32[4,1,128], index: 13, kind: input, shape index: {}]   ;;  %s4814_s14 = inlined_call_operand.vmem [shape: bf16[4,256,128], index: 14, kind: input, shape index: {}]   ;;  %s4815_s15 = inlined_call_operand.vmem [shape: f32[4,1,128], index: 15, kind: input, shape index: {}]   ;;  %s4816_s16 = inlined_call_operand.hbm [shape: bf16[4,128,128], index: 16, kind: input, shape index: {}]   ;;  %s4817_s17 = inlined_call_operand.vmem [shape: f32[4,1,128], index: 17, kind: input, shape index: {}]   ;;  %s4818_s18 = inlined_call_operand.hbm [shape: f32[8,128], index: 18, kind: output, shape index: {}]  }
   0x1   :  { %4833 = sst [smem:[#allocation22_spill]] %s4800_s0 }
   0x2   :  { %4834 = sst [smem:[#allocation23_spill]] %s4801_s1 }
   0x3   :  { %4835 = sst [smem:[#allocation24_spill]] %s4802_s2 }
   0x4   :  { %4836 = sst [smem:[#allocation25_spill]] %s4803_s3 }
   0x5   :  { %4837 = sst [smem:[#allocation26_spill]] %s4804_s4 }
   0x6   :  { %4838 = sst [smem:[#allocation27_spill]] %s4805_s5 }
   0x7   :  { %4839 = sst [smem:[#allocation28_spill]] %s4806_s6 }
   0x8   :  { %4840 = sst [smem:[#allocation29_spill]] %s4807_s7 }
   0x9   :  { %4841 = sst [smem:[#allocation30_spill]] %s4808_s8 }
   0xa   :  { %4842 = sst [smem:[#allocation31_spill]] %s4809_s9 }
   0xb   :  { %4843 = sst [smem:[#allocation32_spill]] %s4812_s12 }
   0xc   :  { %4844 = sst [smem:[#allocation33_spill]] %s4818_s18 }
   0xd   :  { %23 = vsyncpa [#allocation5], 0 }
   0xe   :  { %25 = vsyncpa [#allocation5 + $0x1], 0 }
   0xf   :  { %26 = vsyncpa [#allocation8], 0 }
  0x10   :  { %28 = vsyncpa [#allocation8 + $0x1], 0 }
  0x11   :  { %29 = vsyncpa [#allocation11], 0 }
  0x12   :  { %31 = vsyncpa [#allocation11 + $0x1], 0 }
  0x13   :  { %32 = vsyncpa [#allocation6], 0  ;;  %s3810_s27 = smov 0   ;;  %s3812_s28 = smov 0  }
  0x14   :  { %s3814_s29 = smov 0   ;;  %s3816_s30 = smov 0  }
  0x15   :  { %s3818_s0 = smov 0   ;;  %s3820_s19 = smov 0  }
  0x16 LB: > { %4845 = sst [smem:[#allocation17_spill]] %s3689_s29  ;;  %s3839_s1 = sadd.s32 4294967295, %s3701_s19   ;;  %s3701_s19 = sphi %s3820_s19, %s38_s19   ;;  %s3697_s0 = sphi %s3818_s0, %s4881_s0   ;;  %s3693_s30 = sphi %s3816_s30, %s4880_s30   ;;  %s3689_s29 = sphi %s3814_s29, %s4879_s29   ;;  %s3685_s28 = sphi %s3812_s28, %s4883_s28   ;;  %s3681_s27 = sphi %s3810_s27, %s4882_s27  }
  0x17   : > { %4846 = sst [smem:[#allocation18_spill]] %s3697_s0  ;;  %s50_s20 = sadd.s32 1, %s3697_s0 }
  0x18   : > { %4847 = sst [smem:[#allocation19_spill]] %s3701_s19  ;;  %p52_p0 = scmp.ge.s32.totalorder %s50_s20, 4 }
  0x19   : > { %s250_s21 = sadd.s32 1, %s3689_s29  ;;  %p257_p1 = scmp.ne.s32.totalorder %s3689_s29, %s3685_s28 }
  0x1a   : > { %p258_p2 = scmp.eq.s32.totalorder %s3701_s19, 0  ;;  %s4885_s20 = smov (%p52_p0, %s50_s20), 0 }
  0x1b   : > { %4848 = sst [smem:[#allocation20_spill]] %s4885_s20  ;;  %p263_p4 = scmp.ne.s32.totalorder %s3685_s28, %s3681_s27 }
  0x1c   : > { %p259_p3 = por %p258_p2, %p257_p1  ;;  %s247_s22 = ssub.s32 %s3697_s0, %s4885_s20 }
  0x1d   : > { %p264_p5 = scmp.eq.s32.totalorder %s3839_s1, 0  ;;  %p248_p6 = scmp.eq.s32.totalorder %s247_s22, 0 }
  0x1e   : > { %p3242_p8 = scmp.lt.s32.totalorder %s3701_s19, 4  ;;  %s3861_s24 = sand.u32 1, %s3689_s29  }
  0x1f   : > { %p3852_p7 = por %p264_p5, %p263_p4  ;;  %s3864_s25 = sshll.u32 %s3697_s0, 10 }
  0x20   : > { %s3858_s23 = scalar_select %p248_p6, %s3689_s29, %s250_s21  }
  0x21   : > { %s4849_s2 = scalar_select %p3852_p7, 1, 0 }
  0x22   : > { %4850 = sst [smem:[#allocation21_spill]] %s3858_s23  ;;  %s3867_s26 = sshll.u32 %s3861_s24, 6 }
  0x23   : > { %p3869_p9 = pnand %p3242_p8, %p259_p3  ;;  %s614_s22 = sand.u32 1, %s3701_s19  }
  0x24   : > { %s4852_s9 = sld [smem:[#allocation31_spill]]  ;;  %s618_s0 = scalar_lea.vmem [#allocation7], %s3867_s26 }
  0x25   : > { %s625_s23 = sshll.u32 %s618_s0, 4  ;;  %s3884_s29 = scalar_lea.sflag [#allocation8], %s614_s22  ;;  %s3881_s23 = int_to_ptr.vmem [resolvable:$true] %s625_s23 }
  0x26   : > { %p3890_p12 = pneg %p3869_p9 }
  0x2a   : > { %s3878_s21 = scalar_lea.hbm %s4852_s9, %s3864_s25  ;;  %s3498_s0 = scalar_lea.hbm %s4852_s9, 4096 }
  0x2b   : > { %s3493_s3 = scalar_lea.hbm %s3878_s21, 1024  ;;  %p3499_p1 = scmp.lt.u32.totalorder %s3878_s21, %s4852_s9 }
  0x2c   : > { %p3494_p11 = scmp.ne.s32.totalorder %s3878_s21, %s3493_s3  ;;  %p3500_p2 = scmp.lt.u32.totalorder %s3498_s0, %s3493_s3 }
  0x2d   : > { %p3502_p4 = scmp.lt.u32.totalorder %s3493_s3, %s3878_s21 }
  0x2e   : > { %p3496_p13 = pnand %p3890_p12, %p3494_p11  ;;  %p3501_p3 = por %p3500_p2, %p3499_p1 }
  0x30   : > { %p3497_p0 = pneg %p3496_p13  ;;  %p3503_p5 = por %p3502_p4, %p3501_p3 }
  0x32   : > { %p3504_p6 = pnand %p3503_p5, %p3497_p0 }
  0x34   : > { %3507 = shalt.err (!%p3504_p6)
}
  0x35   : > { %s3508_s22 = scalar_lea.vmem %s3881_s23, 1024  ;;  %s3703_s18 = smov [#allocation7]  }
  0x36   : > { %p3509_p8 = scmp.ne.s32.totalorder %s3881_s23, %s3508_s22  ;;  %s3513_s20 = sshll.u32 %s3703_s18, 4  ;;  %s3514_s20 = int_to_ptr.vmem [resolvable:$false] %s3513_s20 }
  0x37   : > { %s3515_s5 = scalar_lea.vmem %s3514_s20, 2048  ;;  %p3516_p10 = scmp.lt.s32.totalorder %s3881_s23, %s3514_s20 }
  0x38   : > { %p3511_p11 = pnand %p3509_p8, %p3890_p12  ;;  %p3517_p7 = scmp.lt.s32.totalorder %s3515_s5, %s3508_s22 }
  0x3a   : > { %p3512_p13 = pneg %p3511_p11  ;;  %p3518_p1 = por %p3517_p7, %p3516_p10 }
  0x3c   : > { %p3519_p2 = pnand %p3518_p1, %p3512_p13 }
  0x3e   : > { %3522 = shalt.err (!%p3519_p2)
}
  0x3f   : > { %s4827_s3 = smov 64   ;;  %s4829_s7 = smov 4  }
  0x40   : > { %3235 = dma.hbm_to_vmem [thread:$0]  (!%p3869_p9), %s3878_s21, 1024, %s3881_s23, %s3884_s29, %s4827_s3, %s4827_s3, %s4829_s7  }
  0x41   : > { %p714_p7 = scmp.lt.s32.totalorder %s3701_s19, 5  ;;  %p4854_p10 = scmp.ge.s32.totalorder %s3701_s19, 1 }
  0x42   : > { %s4856_s8 = sld [smem:[#allocation30_spill]]  ;;  %s597_s5 = scalar_lea.vmem [#allocation4], %s3867_s26 }
  0x43   : > { %p3920_p0 = pnand %p4854_p10, %p714_p7  ;;  %s604_s9 = sshll.u32 %s597_s5, 4  ;;  %s3931_s9 = int_to_ptr.vmem [resolvable:$true] %s604_s9 }
  0x44   : > { %s594_s23 = scalar_lea.sflag [#allocation5], %s3861_s24 }
  0x45   : > { %s4855_s0 = scalar_select %p3920_p0, 1, 0 }
  0x48   : > { %s3928_s20 = scalar_lea.hbm %s4856_s8, %s3864_s25  ;;  %s3528_s22 = scalar_lea.hbm %s4856_s8, 4096 }
  0x49   : > { %s3523_s21 = scalar_lea.hbm %s3928_s20, 1024  ;;  %p3529_p6 = scmp.lt.u32.totalorder %s3928_s20, %s4856_s8 }
  0x4a   : > { %p3524_p3 = scmp.ne.s32.totalorder %s3928_s20, %s3523_s21  ;;  %p3530_p8 = scmp.lt.u32.totalorder %s3528_s22, %s3523_s21 }
  0x4b   : > { %p3532_p13 = scmp.lt.u32.totalorder %s3523_s21, %s3928_s20 }
  0x4c   : > { %p3526_p4 = pnand %p3524_p3, %p3890_p12  ;;  %p3531_p11 = por %p3530_p8, %p3529_p6 }
  0x4e   : > { %p3527_p5 = pneg %p3526_p4  ;;  %p3533_p1 = por %p3532_p13, %p3531_p11 }
  0x50   : > { %p3534_p2 = pnand %p3533_p1, %p3527_p5 }
  0x52   : > { %3537 = shalt.err (!%p3534_p2)
}
  0x53   : > { %s3538_s5 = scalar_lea.vmem %s3931_s9, 1024  ;;  %s3706_s3 = smov [#allocation4]  }
  0x54   : > { %p3539_p7 = scmp.ne.s32.totalorder %s3931_s9, %s3538_s5  ;;  %s3543_s7 = sshll.u32 %s3706_s3, 4  ;;  %s3544_s7 = int_to_ptr.vmem [resolvable:$false] %s3543_s7 }
  0x55   : > { %s3545_s19 = scalar_lea.vmem %s3544_s7, 2048  ;;  %p3546_p4 = scmp.lt.s32.totalorder %s3931_s9, %s3544_s7 }
  0x56   : > { %p3541_p10 = pnand %p3539_p7, %p3890_p12  ;;  %p3547_p0 = scmp.lt.s32.totalorder %s3545_s19, %s3538_s5 }
  0x58   : > { %p3542_p3 = pneg %p3541_p10  ;;  %p3548_p6 = por %p3547_p0, %p3546_p4 }
  0x5a   : > { %p3549_p8 = pnand %p3548_p6, %p3542_p3 }
  0x5c   : > { %3552 = shalt.err (!%p3549_p8)
}
  0x5d   : > { %s4857_s21 = smov 4   ;;  %s4858_s22 = smov 64  }
  0x5e   : > { %3232 = dma.hbm_to_vmem [thread:$0]  (!%p3869_p9), %s3928_s20, 1024, %s3931_s9, %s594_s23, %s4858_s22, %s4858_s22, %s4857_s21  }
  0x5f   : > { %s4859_s12 = sld [smem:[#allocation32_spill]]  ;;  %s652_s7 = scalar_lea.vmem [#allocation9], %s3867_s26 }
  0x60   : > { %s659_s19 = sshll.u32 %s652_s7, 4  ;;  %s3967_s19 = int_to_ptr.vmem [resolvable:$true] %s659_s19 }
  0x65   : > { %s3964_s5 = scalar_lea.hbm %s4859_s12, %s3864_s25  ;;  %s3558_s20 = scalar_lea.hbm %s4859_s12, 4096 }
  0x66   : > { %s3553_s8 = scalar_lea.hbm %s3964_s5, 1024  ;;  %p3559_p13 = scmp.lt.u32.totalorder %s3964_s5, %s4859_s12 }
  0x67   : > { %p3554_p0 = scmp.ne.s32.totalorder %s3964_s5, %s3553_s8  ;;  %p3560_p1 = scmp.lt.u32.totalorder %s3558_s20, %s3553_s8 }
  0x68   : > { %p3562_p7 = scmp.lt.u32.totalorder %s3553_s8, %s3964_s5 }
  0x69   : > { %p3556_p5 = pnand %p3554_p0, %p3890_p12  ;;  %p3561_p2 = por %p3560_p1, %p3559_p13 }
  0x6b   : > { %p3557_p11 = pneg %p3556_p5  ;;  %p3563_p10 = por %p3562_p7, %p3561_p2 }
  0x6d   : > { %p3564_p3 = pnand %p3563_p10, %p3557_p11 }
  0x6f   : > { %3567 = shalt.err (!%p3564_p3)
}
  0x70   : > { %s3568_s3 = scalar_lea.vmem %s3967_s19, 1024  ;;  %s3707_s4 = smov [#allocation9]  }
  0x71   : > { %p3569_p4 = scmp.ne.s32.totalorder %s3967_s19, %s3568_s3  ;;  %s3573_s7 = sshll.u32 %s3707_s4, 4  ;;  %s3574_s7 = int_to_ptr.vmem [resolvable:$false] %s3573_s7 }
  0x72   : > { %s3575_s9 = scalar_lea.vmem %s3574_s7, 2048  ;;  %p3576_p0 = scmp.lt.s32.totalorder %s3967_s19, %s3574_s7 }
  0x73   : > { %p3571_p6 = pnand %p3569_p4, %p3890_p12  ;;  %p3577_p5 = scmp.lt.s32.totalorder %s3575_s9, %s3568_s3 }
  0x75   : > { %p3572_p8 = pneg %p3571_p6  ;;  %p3578_p13 = por %p3577_p5, %p3576_p0 }
  0x77   : > { %p3579_p1 = pnand %p3578_p13, %p3572_p8 }
  0x79   : > { %3582 = shalt.err (!%p3579_p1)
}
  0x7a   : > { %3238 = dma.hbm_to_vmem [thread:$0]  (!%p3869_p9), %s3964_s5, 1024, %s3967_s19, %s3884_s29, %s4858_s22, %s4858_s22, %s4857_s21  }
  0x7b   : > { %s3998_s23 = scalar_lea.hbm %s4816_s16, %s3864_s25  ;;  %s693_s18 = scalar_lea.vmem [#allocation10], %s3867_s26 }
  0x7c   : > { %s700_s3 = sshll.u32 %s693_s18, 4  ;;  %s690_s4 = scalar_lea.sflag [#allocation11], %s3861_s24  ;;  %s4001_s3 = int_to_ptr.vmem [resolvable:$true] %s700_s3 }
  0x7d   : > { %s3583_s7 = scalar_lea.hbm %s3998_s23, 1024  ;;  %s3588_s19 = scalar_lea.hbm %s4816_s16, 4096 }
  0x7e   : > { %p3584_p11 = scmp.ne.s32.totalorder %s3998_s23, %s3583_s7  ;;  %p3589_p10 = scmp.lt.u32.totalorder %s3998_s23, %s4816_s16 }
  0x7f   : > { %p3590_p3 = scmp.lt.u32.totalorder %s3588_s19, %s3583_s7  ;;  %p3592_p6 = scmp.lt.u32.totalorder %s3583_s7, %s3998_s23 }
  0x80   : > { %p3586_p2 = pnand %p3584_p11, %p3890_p12 }
  0x81   : > { %p3591_p4 = por %p3590_p3, %p3589_p10 }
  0x82   : > { %p3587_p7 = pneg %p3586_p2 }
  0x83   : > { %p3593_p8 = por %p3592_p6, %p3591_p4 }
  0x85   : > { %p3594_p0 = pnand %p3593_p8, %p3587_p7 }
  0x87   : > { %3597 = shalt.err (!%p3594_p0)
}
  0x88   : > { %s3598_s26 = scalar_lea.vmem %s4001_s3, 1024  ;;  %s3708_s8 = smov [#allocation10]  }
  0x89   : > { %p3599_p5 = scmp.ne.s32.totalorder %s4001_s3, %s3598_s26  ;;  %s3603_s20 = sshll.u32 %s3708_s8, 4  ;;  %s3604_s20 = int_to_ptr.vmem [resolvable:$false] %s3603_s20 }
  0x8a   : > { %s3605_s18 = scalar_lea.vmem %s3604_s20, 2048  ;;  %p3606_p11 = scmp.lt.s32.totalorder %s4001_s3, %s3604_s20 }
  0x8b   : > { %p3601_p13 = pnand %p3599_p5, %p3890_p12  ;;  %p3607_p2 = scmp.lt.s32.totalorder %s3605_s18, %s3598_s26 }
  0x8d   : > { %p3602_p1 = pneg %p3601_p13  ;;  %p3608_p10 = por %p3607_p2, %p3606_p11 }
  0x8f   : > { %p3609_p3 = pnand %p3608_p10, %p3602_p1 }
  0x91   : > { %3612 = shalt.err (!%p3609_p3)
}
  0x92   : > { %3241 = dma.hbm_to_vmem [thread:$0]  (!%p3869_p9), %s3998_s23, 1024, %s4001_s3, %s690_s4, %s4858_s22, %s4858_s22, %s4857_s21  }
  0x93   : > { %p4860_p12 = scmp.ne.s32.totalorder %s4855_s0, 0 }
  0x94   : > { %s720_s6 = sand.u32 (!%p4860_p12), 1, %s3685_s28   ;;  %p4861_p7 = scmp.ne.s32.totalorder (!%p4860_p12), %s4849_s2, 0 }
  0x95   : > { %718 = sbr.rel (%p4860_p12) target bundleno = 1660 (0x67c), region = 92  ;;  %s2888_s7 = sshll.u32 (!%p4860_p12), %s720_s6, 6 }
  0x96   : > { %s721_s29 = scalar_lea.sflag (!%p4860_p12), [#allocation5], %s720_s6  ;;  %s4033_s5 = scalar_lea.vmem (!%p4860_p12), [#allocation4], %s2888_s7 }
  0x9c   : > { %3664 = dma.done.wait (%p4861_p7), %s721_s29, 1024  }
  0x9d   : > { %3666 = vsyncadd (%p4861_p7), %s721_s29, 4294966272  ;;  %s729_s24 = sand.u32 1, %s3839_s1   ;;  %s4040_s21 = scalar_lea.vmem [#allocation7], %s2888_s7 }
  0x9e   : > { %s730_s27 = scalar_lea.sflag [#allocation8], %s729_s24 }
  0x9f   : > { %3668 = dma.done.wait (%p4861_p7), %s730_s27, 2048  }
  0xa0   : > { %3670 = vsyncadd (%p4861_p7), %s730_s27, 4294965248  ;;  %s4046_s0 = scalar_lea.vmem [#allocation9], %s2888_s7  ;;  %s748_s22 = scalar_lea.sflag [#allocation11], %s720_s6 }
  0xa1   : > { %s4048_s23 = scalar_lea.vmem [#allocation10], %s2888_s7 }
  0xa2   : > { %3672 = dma.done.wait (%p4861_p7), %s748_s22, 1024  }
  0xa3   : > { %3674 = vsyncadd (%p4861_p7), %s748_s22, 4294966272  ;;  %p885_p9 = scmp.lt.s32.totalorder %s3693_s30, 3  ;;  %p907_p4 = scmp.eq.s32.totalorder %s3693_s30, 0 }
  0xa4   : > { %s4862_s25 = sld [smem:[#allocation22_spill]] (%p907_p4) }
  0xa5   : > { %s4887_s30 = smov (!%p885_p9, %s3693_s30), 3  ;;  %912 = sbr.rel (!%p907_p4) target bundleno = 172 (0xac), region = 112 }
  0xa6   : > { %s2892_s3 = sshll.u32 %s4887_s30, 3  ;;  %s894_s18 = scalar_lea.vmem %s4813_s13, %s4887_s30 }
  0xa7   : > { %s4067_s26 = scalar_lea.vmem %s4810_s10, %s2892_s3  ;;  %s3002_s6 = sshll.u32 %s4887_s30, 7 }
  0xa8   : > { %s902_s24 = scalar_lea.vmem %s4815_s15, %s4887_s30  ;;  %s4081_s12 = scalar_lea.vmem %s4814_s14, %s3002_s6 }
  0xa9   : > { %s905_s2 = scalar_lea.vmem %s4817_s17, %s4887_s30 }
  0xaa   : > { %v913_v0 = vld [vmem:[%s4862_s25] sm:$0xff] (%p907_p4) }
  0xab   : > { %914 = vst [vmem:[#allocation12] sm:$0xff] (%p907_p4), %v913_v0 }
  0xac PF: > { %v3313_v1 = vld [vmem:[%s4033_s5] sm:$0xff]   ;;  %v3709_v2 = vmov 0.0   ;;  %v3710_v4 = vmov 0   ;;  %s4863_s20 = sld [smem:[#allocation23_spill]]  ;;  %v3315_v6 = vld [vmem:[%s4033_s5 + $0x8] sm:$0xff]   ;;  %vm3711_vm0 = vmmov 0   ;;  %s4873_s22 = scalar_lea.vmem %s4811_s11, %s4887_s30 }
  0xad   : > { %3087 = vmatprep.subr.bf16.mxu0 %v3709_v2  ;;  %3107 = vmatprep.subr.bf16.mxu1 %v3709_v2  ;;  %v3314_v3 = vld [vmem:[%s4040_s21] sm:$0xff]   ;;  %v3316_v7 = vld [vmem:[%s4040_s21 + $0x8] sm:$0xff]   ;;  %v3317_v9 = vld [vmem:[%s4033_s5 + $0x10] sm:$0xff]   ;;  %s4864_s19 = sld [smem:[#allocation24_spill]]  ;;  %vm1357_vm7 = vcmask 130048   ;;  %s4870_s25 = sld [smem:[#allocation27_spill]] }
  0xae   : > { %3088 = vmatpush3.bf16.msra.mxu0 %v3313_v1  ;;  %3301 = vset.pattern.permute.xlu0 %v3710_v4  ;;  %v3318_v10 = vld [vmem:[%s4040_s21 + $0x10] sm:$0xff]   ;;  %v3319_v14 = vld [vmem:[%s4033_s5 + $0x18] sm:$0xff]   ;;  %v3321_v20 = vld [vmem:[%s4033_s5 + $0x20] sm:$0xff]   ;;  %s4871_s9 = sld [smem:[#allocation29_spill]]  ;;  %p3243_p6 = scmp.eq.s32.totalorder %s3839_s1, 3 }
  0xaf   : > { %3108 = vmatpush3.bf16.msra.mxu1 %v3314_v3  ;;  %3089 = vmatprep.subr.bf16.mxu0 %v3709_v2  ;;  %v3320_v15 = vld [vmem:[%s4040_s21 + $0x18] sm:$0xff]   ;;  %v3322_v21 = vld [vmem:[%s4040_s21 + $0x20] sm:$0xff]   ;;  %v3323_v23 = vld [vmem:[%s4033_s5 + $0x28] sm:$0xff]  }
  0xb0   : > { %3109 = vmatprep.subr.bf16.mxu1 %v3709_v2  ;;  %3302 = vset.pattern.permute.xlu1 %v3710_v4  ;;  %v3324_v27 = vld [vmem:[%s4040_s21 + $0x28] sm:$0xff]   ;;  %v3325_v30 = vld [vmem:[%s4033_s5 + $0x30] sm:$0xff]   ;;  %v3327_v33 = vld [vmem:[%s4033_s5 + $0x38] sm:$0xff]  }
  0xb1   : > { %3103 = vmatprep.mubr.msk.bf16.mxu0 %vm3711_vm0, %v3709_v2  ;;  %3123 = vmatprep.mubr.msk.bf16.mxu1 %vm3711_vm0, %v3709_v2  ;;  %v3326_v31 = vld [vmem:[%s4040_s21 + $0x30] sm:$0xff]   ;;  %v3328_v42 = vld [vmem:[%s4040_s21 + $0x38] sm:$0xff]  }
  0xb2   : > { %v1133_v5 = vld [vmem:[%s4863_s20] sm:$0xff]  ;;  %v1134_v8 = vld [vmem:[%s4863_s20 + $0x8] sm:$0xff]  ;;  %3090 = vmatpush3.bf16.msra.mxu0 %v3315_v6  ;;  %v1135_v11 = vld [vmem:[%s4863_s20 + $0x10] sm:$0xff] }
  0xb3   : > { %1150 = vperm.xlu0 %3301, %v1133_v5   ;;  %3110 = vmatpush3.bf16.msra.mxu1 %v3316_v7  ;;  %s4865_s3 = smov %s4864_s19  ;;  %v1213_v12 = vld [vmem:[%s4864_s19] sm:$0xff]  ;;  %v1136_v24 = vld [vmem:[%s4863_s20 + $0x18] sm:$0xff]  ;;  %v1139_v32 = vld [vmem:[%s4863_s20 + $0x30] sm:$0xff]  ;;  %s4866_s19 = sld [smem:[#allocation26_spill]] }
  0xb4   : > { %3091 = vmatprep.subr.bf16.mxu0 %v3709_v2  ;;  %3111 = vmatprep.subr.bf16.mxu1 %v3709_v2  ;;  %v1215_v13 = vld [vmem:[%s4865_s3 + $0x10] sm:$0xff]  ;;  %v1229_v16 = vadd.s32 8, %v1213_v12  ;;  %v1214_v17 = vld [vmem:[%s4865_s3 + $0x8] sm:$0xff]  ;;  %v1137_v22 = vld [vmem:[%s4863_s20 + $0x20] sm:$0xff] }
  0xb5   : > { %v1231_v18 = vadd.s32 8, %v1215_v13  ;;  %v1230_v19 = vadd.s32 8, %v1214_v17  ;;  %v1217_v25 = vld [vmem:[%s4865_s3 + $0x20] sm:$0xff]  ;;  %v1216_v26 = vld [vmem:[%s4865_s3 + $0x18] sm:$0xff]  ;;  %v1219_v35 = vld [vmem:[%s4865_s3 + $0x30] sm:$0xff] }
  0xb6   : > { %3092 = vmatpush3.bf16.msra.mxu0 %v3317_v9  ;;  %1246 = vperm.xlu1 %3302, %v1229_v16   ;;  %v1233_v28 = vadd.s32 8, %v1217_v25  ;;  %v1232_v29 = vadd.s32 8, %v1216_v26  ;;  %v919_v34 = vld [vmem:[#allocation12] sm:$0xff]  ;;  %v1218_v36 = vld [vmem:[%s4865_s3 + $0x28] sm:$0xff]  ;;  %v1220_v38 = vld [vmem:[%s4865_s3 + $0x38] sm:$0xff]  ;;  %v1235_v43 = vadd.s32 8, %v1219_v35 }
  0xb7   : > { %1153 = vperm.xlu0 %3301, %v1134_v8   ;;  %3112 = vmatpush3.bf16.msra.mxu1 %v3318_v10  ;;  %v1221_v37 = vld [vmem:[%s4865_s3 + $0x40] sm:$0xff]  ;;  %v1138_v39 = vld [vmem:[%s4863_s20 + $0x28] sm:$0xff]  ;;  %v1223_v40 = vld [vmem:[%s4865_s3 + $0x50] sm:$0xff]  ;;  %v1234_v44 = vadd.s32 8, %v1218_v36  ;;  %v1236_v46 = vadd.s32 8, %v1220_v38  ;;  %v920_v47 = vpack.c.bf16 %v919_v34, %v919_v34 }
  0xb8   : > { %3093 = vmatprep.subr.bf16.mxu0 %v3709_v2  ;;  %3113 = vmatprep.subr.bf16.mxu1 %v3709_v2  ;;  %v1222_v41 = vld [vmem:[%s4865_s3 + $0x48] sm:$0xff]  ;;  %v1237_v45 = vadd.s32 8, %v1221_v37  ;;  %v1239_v48 = vadd.s32 8, %v1223_v40  ;;  %v1141_v50 = vld [vmem:[%s4863_s20 + $0x40] sm:$0xff]  ;;  %v1140_v51 = vld [vmem:[%s4863_s20 + $0x38] sm:$0xff] }
  0xb9   : > { %v1238_v49 = vadd.s32 8, %v1222_v41  ;;  %v1143_v52 = vld [vmem:[%s4863_s20 + $0x50] sm:$0xff]  ;;  %v1142_v53 = vld [vmem:[%s4863_s20 + $0x48] sm:$0xff]  ;;  %v1145_v54 = vld [vmem:[%s4863_s20 + $0x60] sm:$0xff]  ;;  %s4867_s21 = smov %s4866_s19 }
  0xba   : > { %3094 = vmatpush3.bf16.msra.mxu0 %v3319_v14  ;;  %1249 = vperm.xlu1 %3302, %v1230_v19   ;;  %v1225_v55 = vld [vmem:[%s4865_s3 + $0x60] sm:$0xff]  ;;  %v1144_v56 = vld [vmem:[%s4863_s20 + $0x58] sm:$0xff]  ;;  %v1147_v60 = vld [vmem:[%s4863_s20 + $0x70] sm:$0xff]  ;;  %v1131_v14 = vlaneseq }
  0xbb   : > { %1156 = vperm.xlu0 %3301, %v1135_v11   ;;  %3114 = vmatpush3.bf16.msra.mxu1 %v3320_v15  ;;  %v1224_v57 = vld [vmem:[%s4865_s3 + $0x58] sm:$0xff]  ;;  %v1241_v58 = vadd.s32 8, %v1225_v55  ;;  %v1227_v61 = vld [vmem:[%s4865_s3 + $0x70] sm:$0xff]  ;;  %v1146_v62 = vld [vmem:[%s4863_s20 + $0x68] sm:$0xff] }
  0xbc   : > { %3095 = vmatprep.subr.bf16.mxu0 %v3709_v2  ;;  %3115 = vmatprep.subr.bf16.mxu1 %v3709_v2  ;;  %v1240_v59 = vadd.s32 8, %v1224_v57  ;;  %v1226_v63 = vld [vmem:[%s4865_s3 + $0x68] sm:$0xff]  ;;  %v1243_v0 = vadd.s32 8, %v1227_v61  ;;  %v1479_v3 = vld [vmem:[%s4866_s19] sm:$0xff]  ;;  %v1148_v5 = vld [vmem:[%s4863_s20 + $0x78] sm:$0xff]  ;;  %v4249_v15 = vand.u32 127, %v1131_v14 }
  0xbd   : > { %v1242_v1 = vadd.s32 8, %v1226_v63  ;;  %v1228_v6 = vld [vmem:[%s4865_s3 + $0x78] sm:$0xff]  ;;  %v1481_v7 = vld [vmem:[%s4867_s21 + $0x10] sm:$0xff]  ;;  %v1484_v9 = vld [vmem:[%s4867_s21 + $0x28] sm:$0xff] }
  0xbe   : > { %3096 = vmatpush3.bf16.msra.mxu0 %v3321_v20  ;;  %1159 = vperm.xlu1 %3302, %v1136_v24   ;;  %v1244_v8 = vadd.s32 8, %v1228_v6  ;;  %v1480_v10 = vld [vmem:[%s4867_s21 + $0x8] sm:$0xff]  ;;  %v1482_v12 = vld [vmem:[%s4867_s21 + $0x18] sm:$0xff]  ;;  %v1483_v24 = vld [vmem:[%s4867_s21 + $0x20] sm:$0xff] }
  0xbf   : > { %1252 = vperm.xlu0 %3301, %v1231_v18   ;;  %3116 = vmatpush3.bf16.msra.mxu1 %v3322_v21  ;;  %v1488_v11 = vld [vmem:[%s4867_s21 + $0x48] sm:$0xff]  ;;  %v1485_v25 = vld [vmem:[%s4867_s21 + $0x30] sm:$0xff]  ;;  %v1486_v26 = vld [vmem:[%s4867_s21 + $0x38] sm:$0xff] }
  0xc0   : > { %3097 = vmatprep.subr.bf16.mxu0 %v3709_v2  ;;  %3117 = vmatprep.subr.bf16.mxu1 %v3709_v2  ;;  %v4245_v13 = vld [vmem:[%s4867_s21 + $0x68] sm:$0xff]  ;;  %v1493_v40 = vld [vmem:[%s4867_s21 + $0x70] sm:$0xff] }
  0xc2   : > { %3098 = vmatpush3.bf16.msra.mxu0 %v3323_v23  ;;  %1255 = vperm.xlu1 %3302, %v1232_v29   ;;  %v3712_v23 = vmov 1   ;;  %v1491_v29 = vld [vmem:[%s4867_s21 + $0x60] sm:$0xff] }
  0xc3   : > { %1162 = vperm.xlu0 %3301, %v1137_v22   ;;  %3118 = vmatpush3.bf16.msra.mxu1 %v3324_v27  ;;  %v1487_v27 = vld [vmem:[%s4867_s21 + $0x40] sm:$0xff] }
  0xc4   : > { %3099 = vmatprep.subr.bf16.mxu0 %v3709_v2  ;;  %3119 = vmatprep.subr.bf16.mxu1 %v3709_v2 }
  0xc6   : > { %3100 = vmatpush3.bf16.msra.mxu0 %v3325_v30  ;;  %1165 = vperm.xlu1 %3302, %v1138_v39   ;;  %v1494_v30 = vld [vmem:[%s4867_s21 + $0x78] sm:$0xff] }
  0xc7   : > { %1258 = vperm.xlu0 %3301, %v1233_v28   ;;  %3120 = vmatpush3.bf16.msra.mxu1 %v3326_v31  ;;  %v1490_v28 = vld [vmem:[%s4867_s21 + $0x58] sm:$0xff]  ;;  %v1489_v31 = vld [vmem:[%s4867_s21 + $0x50] sm:$0xff] }
  0xc8   : > { %3101 = vmatprep.subr.bf16.mxu0 %v3709_v2  ;;  %3121 = vmatprep.subr.bf16.mxu1 %v3709_v2 }
  0xca   : > { %3102 = vmatpush3.bf16.msra.mxu0 %v3327_v33  ;;  %1261 = vperm.xlu1 %3302, %v1234_v44  }
  0xcb   : > { %1168 = vperm.xlu0 %3301, %v1139_v32   ;;  %3122 = vmatpush3.bf16.msra.mxu1 %v3328_v42 }
  0xcd   : > { %3104 = vmatmul.mubr.bf16.vlgmr.msra.gmra.mrb[0].mxu0 %v920_v47 }
  0xce   : > { %3124 = vmatmul.mubr.bf16.vlgmr.msra.gmra.mrb[0].mxu1 %v920_v47  ;;  %1171 = vperm.xlu1 %3302, %v1140_v51  }
  0xcf   : > { %1264 = vperm.xlu0 %3301, %v1235_v43  }
  0xd2   : > { %1267 = vperm.xlu1 %3302, %v1236_v46  }
  0xd3   : > { %1174 = vperm.xlu0 %3301, %v1141_v50  }
  0xd6   : > { %1177 = vperm.xlu1 %3302, %v1142_v53  }
  0xd7   : > { %1270 = vperm.xlu0 %3301, %v1237_v45  }
  0xda   : > { %1273 = vperm.xlu1 %3302, %v1238_v49  }
  0xdb   : > { %1180 = vperm.xlu0 %3301, %v1143_v52  }
  0xde   : > { %1183 = vperm.xlu1 %3302, %v1144_v56  }
  0xdf   : > { %1276 = vperm.xlu0 %3301, %v1239_v48  }
  0xe2   : > { %1279 = vperm.xlu1 %3302, %v1240_v59  }
  0xe3   : > { %1186 = vperm.xlu0 %3301, %v1145_v54  }
  0xe6   : > { %1189 = vperm.xlu1 %3302, %v1146_v62  }
  0xe7   : > { %1282 = vperm.xlu0 %3301, %v1241_v58  }
  0xea   : > { %1285 = vperm.xlu1 %3302, %v1242_v1  }
  0xeb   : > { %1192 = vperm.xlu0 %3301, %v1147_v60  }
  0xee   : > { %1195 = vperm.xlu1 %3302, %v1148_v5  }
  0xef   : > { %1288 = vperm.xlu0 %3301, %v1243_v0  }
  0xf2   : > { %1291 = vperm.xlu1 %3302, %v1244_v8  }
  0xf3   : > { %1498 = vperm.xlu0 %3301, %v1479_v3  }
  0xf6   : > { %1503 = vperm.xlu1 %3302, %v1480_v10  }
  0xf7   : > { %1508 = vperm.xlu0 %3301, %v1481_v7  }
  0xfa   : > { %1513 = vperm.xlu1 %3302, %v1482_v12  }
  0xfb   : > { %1523 = vperm.xlu0 %3301, %v1484_v9  }
  0xfe   : > { %3303 = vset.pattern.permute.xlu1 %v3712_v23 }
  0xff   : > { %1543 = vperm.xlu0 %3301, %v1488_v11   ;;  %1618 = vperm.xlu1 %3303, %v1480_v10  }
 0x103   : > { %1563 = vperm.xlu0 %3301, %v4245_v13   ;;  %1622 = vperm.xlu1 %3303, %v1481_v7  }
 0x107   : > { %3309 = vset.pattern.permute.xlu0 %v3712_v23  ;;  %3304 = vset.pattern.permute.xlu1 %v3710_v4 }
 0x108   : > { %1614 = vperm.xlu0 %3309, %v1479_v3   ;;  %1518 = vperm.xlu1 %3304, %v1483_v24  }
 0x10c   : > { %1626 = vperm.xlu0 %3309, %v1482_v12   ;;  %1528 = vperm.xlu1 %3304, %v1485_v25  }
 0x110   : > { %1630 = vperm.xlu0 %3309, %v1483_v24   ;;  %1533 = vperm.xlu1 %3304, %v1486_v26  }
 0x114   : > { %1642 = vperm.xlu0 %3309, %v1486_v26   ;;  %3305 = vset.pattern.permute.xlu1 %v3712_v23 }
 0x115   : > { %1634 = vperm.xlu1 %3305, %v1484_v9  }
 0x118   : > { %1646 = vperm.xlu0 %3309, %v1487_v27  }
 0x119   : > { %1638 = vperm.xlu1 %3305, %v1485_v25  }
 0x11c   : > { %1658 = vperm.xlu0 %3309, %v1490_v28  }
 0x11d   : > { %3306 = vset.pattern.permute.xlu1 %v3710_v4 }
 0x11e   : > { %1538 = vperm.xlu1 %3306, %v1487_v27  }
 0x120   : > { %1662 = vperm.xlu0 %3309, %v1491_v29  }
 0x122   : > { %1548 = vperm.xlu1 %3306, %v1489_v31  }
 0x124   : > { %1674 = vperm.xlu0 %3309, %v1494_v30  }
 0x126   : > { %1553 = vperm.xlu1 %3306, %v1490_v28  }
 0x128   : > { %3312 = vset.pattern.permute.xlu0 %v3710_v4 }
 0x12a   : > { %3307 = vset.pattern.permute.xlu1 %v3712_v23 }
 0x12b   : > { %1650 = vperm.xlu1 %3307, %v1488_v11  }
 0x12f   : > { %1654 = vperm.xlu1 %3307, %v1489_v31   ;;  %v3330_v31 = vld [vmem:[%s4046_s0 + $0x8] sm:$0xff]  }
 0x132   : > { %v1151_v16 = vpop.permute.xlu0 %1150 }
 0x133   : > { %vm1197_vm1 = vcmp.eq.s32.totalorder %v4249_v15, %v1151_v16  ;;  %3308 = vset.pattern.permute.xlu1 %v3710_v4 }
 0x134   : > { %1558 = vperm.xlu1 %3308, %v1491_v29  }
 0x135   : > { %v1247_v17 = vpop.permute.xlu1 %1246 }
 0x136   : > { %vm1293_vm2 = vcmp.eq.s32.totalorder %v4249_v15, %v1247_v17  ;;  %v1154_v18 = vpop.permute.xlu0 %1153 }
 0x137   : > { %vm1309_vm3 = vmor %vm1197_vm1, %vm1293_vm2  ;;  %vm1198_vm4 = vcmp.eq.s32.totalorder %v4249_v15, %v1154_v18 }
 0x138   : > { %v1325_v20 = vsel %vm1309_vm3, 1.0, %v3709_v2  ;;  %1568 = vperm.xlu1 %3308, %v1493_v40  }
 0x139   : > { %v1250_v19 = vpop.permute.xlu1 %1249 }
 0x13a   : > { %vm1294_vm5 = vcmp.eq.s32.totalorder %v4249_v15, %v1250_v19  ;;  %v1157_v32 = vpop.permute.xlu0 %1156 }
 0x13b   : > { %vm1310_vm6 = vmor %vm1198_vm4, %vm1294_vm5  ;;  %vm1199_vm8 = vcmp.eq.s32.totalorder %v4249_v15, %v1157_v32  ;;  %v3331_v32 = vld [vmem:[%s4046_s0 + $0x10] sm:$0xff]  }
 0x13c   : > { %v1326_v21 = vsel %vm1310_vm6, 1.0, %v3709_v2  ;;  %1573 = vperm.xlu1 %3308, %v1494_v30  }
 0x13d   : > { %v1341_v22 = vpack.c.bf16 %v1326_v21, %v1325_v20  ;;  %v1160_v33 = vpop.permute.xlu1 %1159 }
 0x13e   : > { %v1253_v34 = vpop.permute.xlu0 %1252  ;;  %vm1200_vm12 = vcmp.eq.s32.totalorder %v4249_v15, %v1160_v33  ;;  %v3332_v33 = vld [vmem:[%s4046_s0 + $0x18] sm:$0xff]  }
 0x13f   : > { %3129 = vmatprep.mubr.msk.bf16.mxu0 %vm1357_vm7, %v1341_v22  ;;  %vm1295_vm9 = vcmp.eq.s32.totalorder %v4249_v15, %v1253_v34  ;;  %v3333_v34 = vld [vmem:[%s4046_s0 + $0x20] sm:$0xff]  }
 0x140   : > { %3310 = vset.pattern.permute.xlu1 %v3712_v23  ;;  %vm1311_vm14 = vmor %vm1199_vm8, %vm1295_vm9 }
 0x141   : > { %v1256_v35 = vpop.permute.xlu1 %1255  ;;  %1666 = vperm.xlu1 %3310, %v4245_v13   ;;  %v1327_v61 = vsel %vm1311_vm14, 1.0, %v3709_v2 }
 0x142   : > { %v1163_v36 = vpop.permute.xlu0 %1162  ;;  %vm1296_vm13 = vcmp.eq.s32.totalorder %v4249_v15, %v1256_v35  ;;  %v3334_v35 = vld [vmem:[%s4046_s0 + $0x28] sm:$0xff]  }
 0x143   : > { %vm1201_vm10 = vcmp.eq.s32.totalorder %v4249_v15, %v1163_v36  ;;  %vm1312_vm3 = vmor %vm1200_vm12, %vm1296_vm13  ;;  %v3335_v36 = vld [vmem:[%s4046_s0 + $0x30] sm:$0xff]  }
 0x144   : > { %v1328_v62 = vsel %vm1312_vm3, 1.0, %v3709_v2 }
 0x145   : > { %v1166_v37 = vpop.permute.xlu1 %1165  ;;  %1670 = vperm.xlu1 %3310, %v1493_v40   ;;  %v1342_v6 = vpack.c.bf16 %v1328_v62, %v1327_v61  ;;  %v2127_v61 = vld [vmem:[%s4870_s25 + $0x70] sm:$0xff] }
 0x146   : > { %v1259_v38 = vpop.permute.xlu0 %1258  ;;  %vm1202_vm15 = vcmp.eq.s32.totalorder %v4249_v15, %v1166_v37  ;;  %v3336_v37 = vld [vmem:[%s4046_s0 + $0x38] sm:$0xff]  }
 0x147   : > { %vm1297_vm11 = vcmp.eq.s32.totalorder %v4249_v15, %v1259_v38 }
 0x148   : > { %vm4305_vm2 = vmor %vm1201_vm10, %vm1297_vm11 }
 0x149   : > { %v1262_v39 = vpop.permute.xlu1 %1261  ;;  %3311 = vset.pattern.permute.xlu1 %v3710_v4  ;;  %v1329_v1 = vsel %vm4305_vm2, 1.0, %v3709_v2 }
 0x14a   : > { %v1169_v41 = vpop.permute.xlu0 %1168  ;;  %vm1298_vm1 = vcmp.eq.s32.totalorder %v4249_v15, %v1262_v39 }
 0x14b   : > { %vm1314_vm4 = vmor %vm1202_vm15, %vm1298_vm1  ;;  %vm1203_vm5 = vcmp.eq.s32.totalorder %v4249_v15, %v1169_v41 }
 0x14c   : > { %v1330_v3 = vsel %vm1314_vm4, 1.0, %v3709_v2 }
 0x14d   : > { %v1172_v42 = vpop.permute.xlu1 %1171  ;;  %v1343_v7 = vpack.c.bf16 %v1330_v3, %v1329_v1 }
 0x14e   : > { %v1265_v43 = vpop.permute.xlu0 %1264  ;;  %vm1204_vm10 = vcmp.eq.s32.totalorder %v4249_v15, %v1172_v42  ;;  %v2113_v42 = vld [vmem:[%s4870_s25] sm:$0xff] }
 0x14f   : > { %vm1299_vm6 = vcmp.eq.s32.totalorder %v4249_v15, %v1265_v43  ;;  %2131 = vperm.xlu1 %3311, %v2113_v42   ;;  %v2114_v43 = vld [vmem:[%s4870_s25 + $0x8] sm:$0xff] }
 0x150   : > { %vm1315_vm12 = vmor %vm1203_vm5, %vm1299_vm6  ;;  %2136 = vperm.xlu0 %3312, %v2114_v43  }
 0x151   : > { %v1268_v44 = vpop.permute.xlu1 %1267  ;;  %v1331_v10 = vsel %vm1315_vm12, 1.0, %v3709_v2 }
 0x152   : > { %v1175_v45 = vpop.permute.xlu0 %1174  ;;  %vm1300_vm11 = vcmp.eq.s32.totalorder %v4249_v15, %v1268_v44  ;;  %v2115_v44 = vld [vmem:[%s4870_s25 + $0x10] sm:$0xff] }
 0x153   : > { %vm1205_vm8 = vcmp.eq.s32.totalorder %v4249_v15, %v1175_v45  ;;  %vm1316_vm1 = vmor %vm1204_vm10, %vm1300_vm11  ;;  %v2117_v45 = vld [vmem:[%s4870_s25 + $0x20] sm:$0xff]  ;;  %2141 = vperm.xlu1 %3311, %v2115_v44  }
 0x154   : > { %v1332_v11 = vsel %vm1316_vm1, 1.0, %v3709_v2  ;;  %2151 = vperm.xlu0 %3312, %v2117_v45  }
 0x155   : > { %v1178_v46 = vpop.permute.xlu1 %1177  ;;  %v1344_v17 = vpack.c.bf16 %v1332_v11, %v1331_v10 }
 0x156   : > { %v1271_v47 = vpop.permute.xlu0 %1270  ;;  %vm1206_vm13 = vcmp.eq.s32.totalorder %v4249_v15, %v1178_v46 }
 0x157   : > { %vm1301_vm9 = vcmp.eq.s32.totalorder %v4249_v15, %v1271_v47 }
 0x158   : > { %vm1317_vm15 = vmor %vm1205_vm8, %vm1301_vm9 }
 0x159   : > { %v1274_v48 = vpop.permute.xlu1 %1273  ;;  %v1333_v12 = vsel %vm1317_vm15, 1.0, %v3709_v2 }
 0x15a   : > { %v4291_v49 = vpop.permute.xlu0 %1180  ;;  %vm1302_vm14 = vcmp.eq.s32.totalorder %v4249_v15, %v1274_v48  ;;  %v2116_v48 = vld [vmem:[%s4870_s25 + $0x18] sm:$0xff] }
 0x15b   : > { %vm1318_vm2 = vmor %vm1206_vm13, %vm1302_vm14  ;;  %vm1207_vm3 = vcmp.eq.s32.totalorder %v4249_v15, %v4291_v49  ;;  %v2119_v49 = vld [vmem:[%s4870_s25 + $0x30] sm:$0xff]  ;;  %2146 = vperm.xlu1 %3311, %v2116_v48  }
 0x15c   : > { %v1334_v13 = vsel %vm1318_vm2, 1.0, %v3709_v2  ;;  %2161 = vperm.xlu0 %3312, %v2119_v49  }
 0x15d   : > { %v4293_v50 = vpop.permute.xlu1 %1183  ;;  %v1345_v19 = vpack.c.bf16 %v1334_v13, %v1333_v12 }
 0x15e   : > { %v1277_v51 = vpop.permute.xlu0 %1276  ;;  %vm1208_vm8 = vcmp.eq.s32.totalorder %v4249_v15, %v4293_v50  ;;  %v2118_v50 = vld [vmem:[%s4870_s25 + $0x28] sm:$0xff] }
 0x15f   : > { %vm1303_vm4 = vcmp.eq.s32.totalorder %v4249_v15, %v1277_v51  ;;  %v2121_v51 = vld [vmem:[%s4870_s25 + $0x40] sm:$0xff]  ;;  %2156 = vperm.xlu1 %3311, %v2118_v50  }
 0x160   : > { %vm1319_vm10 = vmor %vm1207_vm3, %vm1303_vm4  ;;  %2171 = vperm.xlu0 %3312, %v2121_v51  }
 0x161   : > { %v4295_v52 = vpop.permute.xlu1 %1279  ;;  %v1335_v20 = vsel %vm1319_vm10, 1.0, %v3709_v2 }
 0x162   : > { %v1187_v53 = vpop.permute.xlu0 %1186  ;;  %vm1304_vm9 = vcmp.eq.s32.totalorder %v4249_v15, %v4295_v52 }
 0x163   : > { %vm1209_vm5 = vcmp.eq.s32.totalorder %v4249_v15, %v1187_v53  ;;  %vm1320_vm14 = vmor %vm1208_vm8, %vm1304_vm9  ;;  %v2120_v53 = vld [vmem:[%s4870_s25 + $0x38] sm:$0xff] }
 0x164   : > { %v1336_v21 = vsel %vm1320_vm14, 1.0, %v3709_v2  ;;  %2166 = vperm.xlu1 %3311, %v2120_v53  }
 0x165   : > { %v1190_v54 = vpop.permute.xlu1 %1189  ;;  %v1346_v26 = vpack.c.bf16 %v1336_v21, %v1335_v20  ;;  %v4456_v20 = vld [vmem:[%s4873_s22] ss:$0 sm:$0xff]  ;;  %v4459_v21 = vld [vmem:[%s4067_s26 + $0x1] ss:$0 sm:$0xff] }
 0x166   : > { %v1283_v8 = vpop.permute.xlu0 %1282  ;;  %vm1210_vm11 = vcmp.eq.s32.totalorder %v4249_v15, %v1190_v54  ;;  %v2123_v54 = vld [vmem:[%s4870_s25 + $0x50] sm:$0xff] }
 0x167   : > { %vm1305_vm6 = vcmp.eq.s32.totalorder %v4249_v15, %v1283_v8  ;;  %2181 = vperm.xlu0 %3312, %v2123_v54  }
 0x168   : > { %vm1321_vm13 = vmor %vm1209_vm5, %vm1305_vm6 }
 0x169   : > { %v1286_v9 = vpop.permute.xlu1 %1285  ;;  %v1337_v23 = vsel %vm1321_vm13, 1.0, %v3709_v2 }
 0x16a   : > { %v1193_v16 = vpop.permute.xlu0 %1192  ;;  %vm1306_vm12 = vcmp.eq.s32.totalorder %v4249_v15, %v1286_v9 }
 0x16b   : > { %vm1322_vm15 = vmor %vm1210_vm11, %vm1306_vm12  ;;  %vm1211_vm1 = vcmp.eq.s32.totalorder %v4249_v15, %v1193_v16 }
 0x16c   : > { %v1338_v24 = vsel %vm1322_vm15, 1.0, %v3709_v2 }
 0x16d   : > { %v1196_v18 = vpop.permute.xlu1 %1195  ;;  %v1347_v27 = vpack.c.bf16 %v1338_v24, %v1337_v23 }
 0x16e   : > { %v1289_v22 = vpop.permute.xlu0 %1288  ;;  %vm1212_vm3 = vcmp.eq.s32.totalorder %v4249_v15, %v1196_v18 }
 0x16f   : > { %vm1307_vm2 = vcmp.eq.s32.totalorder %v4249_v15, %v1289_v22 }
 0x170   : > { %vm1323_vm5 = vmor %vm1211_vm1, %vm1307_vm2 }
 0x171   : > { %v1292_v25 = vpop.permute.xlu1 %1291  ;;  %v1339_v28 = vsel %vm1323_vm5, 1.0, %v3709_v2 }
 0x172   : > { %vm1308_vm4 = vcmp.eq.s32.totalorder %v4249_v15, %v1292_v25  ;;  %v3329_v15 = vld [vmem:[%s4046_s0] sm:$0xff]   ;;  %v1499_v46 = vpop.permute.xlu0 %1498  ;;  %s4872_s0 = sld [smem:[#allocation28_spill]] }
 0x173   : > { %vm1324_vm6 = vmor %vm1212_vm3, %vm1308_vm4  ;;  %3145 = vmatprep.subr.bf16.mxu1 %v3329_v15 }
 0x174   : > { %v1340_v29 = vsel %vm1324_vm6, 1.0, %v3709_v2  ;;  %3146 = vmatpush3.bf16.msra.mxu1 %v3329_v15 }
 0x175   : > { %v1348_v30 = vpack.c.bf16 %v1340_v29, %v1339_v28  ;;  %3147 = vmatprep.subr.bf16.mxu1 %v3330_v31  ;;  %v4366_v38 = vpop.permute.xlu1 %1503 }
 0x176   : > { %v1509_v52 = vpop.permute.xlu0 %1508 }
 0x178   : > { %3148 = vmatpush3.bf16.msra.mxu1 %v3330_v31  ;;  %v2595_v8 = vld [vmem:[%s4872_s0] sm:$0xff] }
 0x179   : > { %3149 = vmatprep.subr.bf16.mxu1 %v3331_v32  ;;  %v4368_v39 = vpop.permute.xlu1 %1513 }
 0x17c   : > { %3150 = vmatpush3.bf16.msra.mxu1 %v3331_v32 }
 0x17d   : > { %3151 = vmatprep.subr.bf16.mxu1 %v3332_v33 }
 0x17e   : > { %v4370_v40 = vpop.permute.xlu1 %1618 }
 0x180   : > { %3152 = vmatpush3.bf16.msra.mxu1 %v3332_v33 }
 0x181   : > { %3153 = vmatprep.subr.bf16.mxu1 %v3333_v34 }
 0x182   : > { %v4372_v41 = vpop.permute.xlu1 %1622 }
 0x183   : > { %v1683_v32 = vmul.f32 %v4459_v21, %v4372_v41 }
 0x184   : > { %3154 = vmatpush3.bf16.msra.mxu1 %v3333_v34 }
 0x185   : > { %3155 = vmatprep.subr.bf16.mxu1 %v3334_v35 }
 0x187   : > { %v4386_v47 = vpop.permute.xlu1 %1518 }
 0x188   : > { %3156 = vmatpush3.bf16.msra.mxu1 %v3334_v35 }
 0x189   : > { %3157 = vmatprep.subr.bf16.mxu1 %v3335_v36 }
 0x18b   : > { %v4400_v4 = vpop.permute.xlu1 %1528 }
 0x18c   : > { %3158 = vmatpush3.bf16.msra.mxu1 %v3335_v36 }
 0x18d   : > { %3159 = vmatprep.subr.bf16.mxu1 %v3336_v37 }
 0x190   : > { %3160 = vmatpush3.bf16.msra.mxu1 %v3336_v37 }
 0x1a0   : > { %v1019_v55 = vpop.f32.mrb[0].mxu0 }
 0x1a1   : > { %v1123_v56 = vpop.f32.mrb[0].mxu1  ;;  %v3105_v57 = vpop.f32.mrb[1].mxu0 }
 0x1a2   : > { %v1129_v58 = vpack.c.bf16 %v1123_v56, %v1019_v55  ;;  %v3125_v59 = vpop.f32.mrb[1].mxu1  ;;  %v1022_v60 = vpop.f32.mrb[2].mxu0  ;;  %v2122_v57 = vld [vmem:[%s4870_s25 + $0x48] sm:$0xff] }
 0x1a3   : > { %v1126_v63 = vpop.f32.mrb[2].mxu1  ;;  %v3106_v0 = vpop.f32.mrb[3].mxu0  ;;  %2176 = vperm.xlu1 %3311, %v2122_v57   ;;  %v2124_v60 = vld [vmem:[%s4870_s25 + $0x58] sm:$0xff] }
 0x1a4   : > { %v3126_v5 = vpop.f32.mrb[3].mxu1  ;;  %3127 = vmatprep.subr.bf16.mxu0 %v1129_v58  ;;  %v1524_v55 = vpop.permute.xlu0 %1523  ;;  %v2126_v63 = vld [vmem:[%s4870_s25 + $0x68] sm:$0xff]  ;;  %v2291_v0 = vld [vmem:[%s4871_s9] sm:$0xff]  ;;  %s4874_s9 = sld [smem:[#allocation25_spill]] }
 0x1a5   : > { %3128 = vmatpush3.bf16.msra.mxu0 %v1129_v58  ;;  %v4408_v56 = vpop.permute.xlu1 %1533  ;;  %v2125_v58 = vld [vmem:[%s4870_s25 + $0x60] sm:$0xff]  ;;  %v2128_v5 = vld [vmem:[%s4870_s25 + $0x78] sm:$0xff] }
 0x1a6   : > { %3177 = vmatprep.subr.bf16.mxu0 %v3709_v2  ;;  %2191 = vperm.xlu0 %3312, %v2125_v58  }
 0x1a7   : > { %2186 = vperm.xlu1 %3311, %v2124_v60  }
 0x1a8   : > { %3130 = vmatmul.mubr.msk.bf16.vlgmr.msra.gmra.mrb[4].mxu0 %vm1357_vm7, %v1342_v6  ;;  %v1544_v62 = vpop.permute.xlu0 %1543 }
 0x1a9   : > { %3133 = vmatprep.mubr.msk.bf16.mxu0 %vm1357_vm7, %v1343_v7  ;;  %v4416_v59 = vpop.permute.xlu1 %1634 }
 0x1aa   : > { %2201 = vperm.xlu0 %3312, %v2127_v61  }
 0x1ab   : > { %2196 = vperm.xlu1 %3311, %v2126_v63  }
 0x1ac   : > { %v1564_v3 = vpop.permute.xlu0 %1563 }
 0x1ad   : > { %v4430_v1 = vpop.permute.xlu1 %1638 }
 0x1ae   : > { %2294 = vperm.xlu0 %3312, %v2291_v0  }
 0x1af   : > { %2206 = vperm.xlu1 %3311, %v2128_v5   ;;  %v1687_v5 = vmul.f32 %v4459_v21, %v4430_v1 }
 0x1b0   : > { %3134 = vmatmul.mubr.msk.bf16.gmra.mrb[8].mxu0 %vm1357_vm7, %v1344_v17  ;;  %v1615_v6 = vpop.permute.xlu0 %1614 }
 0x1b1   : > { %3137 = vmatprep.mubr.msk.bf16.mxu0 %vm1357_vm7, %v1345_v19  ;;  %v4435_v7 = vpop.permute.xlu1 %1538  ;;  %v4449_v19 = vld [vmem:[%s4067_s26] ss:$0 sm:$0xff]  ;;  %v1681_v28 = vmul.f32 %v4459_v21, %v1615_v6 }
 0x1b2   : > { %v1582_v24 = vmul.f32 %v4449_v19, %v1509_v52  ;;  %v1583_v31 = vmul.f32 %v4449_v19, %v4368_v39  ;;  %v1581_v36 = vmul.f32 %v4449_v19, %v4366_v38  ;;  %v1682_v39 = vmul.f32 %v4459_v21, %v4370_v40 }
 0x1b3   : > { %2598 = vperm.xlu1 %3311, %v2595_v8   ;;  %v1585_v49 = vmul.f32 %v4449_v19, %v1524_v55  ;;  %v4487_v38 = vmul.f32 %v4449_v19, %v1544_v62  ;;  %v4493_v52 = vmul.f32 %v4449_v19, %v1564_v3  ;;  %v1584_v40 = vmul.f32 %v4449_v19, %v4386_v47 }
 0x1b4   : > { %v1627_v9 = vpop.permute.xlu0 %1626  ;;  %v1586_v55 = vmul.f32 %v4449_v19, %v4400_v4  ;;  %v1587_v63 = vmul.f32 %v4449_v19, %v4408_v56 }
 0x1b5   : > { %v4440_v10 = vpop.permute.xlu1 %1548  ;;  %v1684_v43 = vmul.f32 %v4459_v21, %v1627_v9 }
 0x1b8   : > { %3138 = vmatmul.mubr.msk.bf16.gmra.mrb[12].mxu0 %vm1357_vm7, %v1346_v26  ;;  %v1631_v11 = vpop.permute.xlu0 %1630 }
 0x1b9   : > { %3141 = vmatprep.mubr.msk.bf16.mxu0 %vm1357_vm7, %v1347_v27  ;;  %v4442_v12 = vpop.permute.xlu1 %1553  ;;  %v1580_v27 = vmul.f32 %v4449_v19, %v1499_v46  ;;  %v1685_v9 = vmul.f32 %v4459_v21, %v1631_v11 }
 0x1bc   : > { %v1643_v16 = vpop.permute.xlu0 %1642 }
 0x1bd   : > { %v4444_v13 = vpop.permute.xlu1 %1650 }
 0x1c0   : > { %3142 = vmatmul.mubr.msk.bf16.gmra.mrb[16].mxu0 %vm1357_vm7, %v1348_v30  ;;  %v1647_v18 = vpop.permute.xlu0 %1646 }
 0x1c1   : > { %3193 = vmatprep.mubr.msk.bf16.mxu0 %vm3711_vm0, %v3709_v2  ;;  %v4446_v17 = vpop.permute.xlu1 %1654 }
 0x1c4   : > { %v1659_v29 = vpop.permute.xlu0 %1658 }
 0x1c5   : > { %v4461_v23 = vpop.permute.xlu1 %1558 }
 0x1c8   : > { %v1663_v54 = vpop.permute.xlu0 %1662 }
 0x1c9   : > { %v4483_v48 = vpop.permute.xlu1 %1568 }
 0x27b   : > { %v3131_v22 = vpop.f32.mrb[4].mxu0 }
 0x27c   : > { %v1425_v25 = vadd.f32 %v3131_v22, %v4456_v20  ;;  %v1416_v26 = vpop.f32.mrb[5].mxu0 }
 0x27d   : > { %v1417_v30 = vadd.f32 %v4456_v20, %v1416_v26  ;;  %v3132_v15 = vpop.f32.mrb[6].mxu0  ;;  %v1689_v26 = vmul.f32 %v4459_v21, %v1647_v18 }
 0x27e   : > { %v1598_v33 = vadd.f32 %v1582_v24, %v1425_v25  ;;  %v1428_v34 = vadd.f32 %v3132_v15, %v4456_v20  ;;  %v1419_v35 = vpop.f32.mrb[7].mxu0  ;;  %v4513_v24 = vpop.permute.xlu1 %1573  ;;  %v1688_v25 = vmul.f32 %v4459_v21, %v1643_v16  ;;  %v1590_v16 = vmul.f32 %v4449_v19, %v4440_v10 }
 0x27f   : > { %v1596_v37 = vadd.f32 %v1580_v27, %v1417_v30  ;;  %v1420_v42 = vadd.f32 %v4456_v20, %v1419_v35  ;;  %v1692_v30 = vmul.f32 %v4459_v21, %v1659_v29  ;;  %v1675_v15 = vpop.permute.xlu0 %1674 }
 0x280   : > { %v4477_v44 = vadd.f32 %v1683_v32, %v1598_v33  ;;  %v1599_v45 = vadd.f32 %v1583_v31, %v1428_v34  ;;  %v1588_v32 = vmul.f32 %v4449_v19, %v4435_v7  ;;  %v1591_v34 = vmul.f32 %v4449_v19, %v4442_v12 }
 0x281   : > { %v4481_v46 = vadd.f32 %v1681_v28, %v1596_v37  ;;  %v1597_v41 = vadd.f32 %v1581_v36, %v1420_v42  ;;  %v1686_v28 = vmul.f32 %v4459_v21, %v4416_v59  ;;  %v4534_v59 = vmul.f32 %v4459_v21, %v1663_v54 }
 0x282   : > { %v2925_v50 = vmul.f32 -1.442695, %v4477_v44  ;;  %v4490_v51 = vadd.f32 %v1684_v43, %v1599_v45  ;;  %v1667_v37 = vpop.permute.xlu1 %1666  ;;  %v4540_v7 = vmul.f32 %v4459_v21, %v1675_v15  ;;  %v1690_v12 = vmul.f32 %v4459_v21, %v4444_v13 }
 0x283   : > { %v2923_v53 = vmul.f32 -1.442695, %v4481_v46  ;;  %v4498_v57 = vadd.f32 %v1682_v39, %v1597_v41  ;;  %v3135_v58 = vpop.f32.mrb[8].mxu0 }
 0x284   : > { %3361 = vpow2.f32 %v2925_v50  ;;  %v2926_v60 = vmul.f32 -1.442695, %v4490_v51  ;;  %v1441_v61 = vadd.f32 %v3135_v58, %v4456_v20  ;;  %v1432_v62 = vpop.f32.mrb[9].mxu0  ;;  %v1691_v50 = vmul.f32 %v4459_v21, %v4446_v17 }
 0x285   : > { %3363 = vpow2.f32 %v2923_v53  ;;  %v2924_v47 = vmul.f32 -1.442695, %v4498_v57  ;;  %v1433_v0 = vadd.f32 %v4456_v20, %v1432_v62  ;;  %v3136_v3 = vpop.f32.mrb[10].mxu0 }
 0x286   : > { %3365 = vpow2.f32 %v2926_v60  ;;  %v1602_v4 = vadd.f32 %v1586_v55, %v1441_v61  ;;  %v1444_v6 = vadd.f32 %v3136_v3, %v4456_v20  ;;  %v1435_v8 = vpop.f32.mrb[11].mxu0 }
 0x287   : > { %3367 = vpow2.f32 %v2924_v47  ;;  %v1600_v22 = vadd.f32 %v1584_v40, %v1433_v0  ;;  %v1436_v56 = vadd.f32 %v4456_v20, %v1435_v8 }
 0x288   : > { %v4517_v27 = vadd.f32 %v1687_v5, %v1602_v4  ;;  %v1603_v1 = vadd.f32 %v1587_v63, %v1444_v6  ;;  %v1592_v63 = vmul.f32 %v4449_v19, %v4461_v23  ;;  %v1671_v6 = vpop.permute.xlu1 %1670  ;;  %v1594_v23 = vmul.f32 %v4449_v19, %v4483_v48 }
 0x289   : > { %v4522_v11 = vadd.f32 %v1685_v9, %v1600_v22  ;;  %v1601_v31 = vadd.f32 %v1585_v49, %v1436_v56  ;;  %v1695_v15 = vmul.f32 %v4459_v21, %v1671_v6 }
 0x28a   : > { %v2929_v18 = vmul.f32 -1.442695, %v4517_v27  ;;  %v4529_v33 = vadd.f32 %v1688_v25, %v1603_v1 }
 0x28b   : > { %v2927_v29 = vmul.f32 -1.442695, %v4522_v11  ;;  %v4537_v35 = vadd.f32 %v1686_v28, %v1601_v31  ;;  %v3139_v36 = vpop.f32.mrb[12].mxu0 }
 0x28c   : > { %3369 = vpow2.f32 %v2929_v18  ;;  %v2930_v10 = vmul.f32 -1.442695, %v4529_v33  ;;  %v1457_v42 = vadd.f32 %v3139_v36, %v4456_v20  ;;  %v1448_v43 = vpop.f32.mrb[13].mxu0  ;;  %v1694_v18 = vmul.f32 %v4459_v21, %v1667_v37 }
 0x28d   : > { %3371 = vpow2.f32 %v2927_v29  ;;  %v2928_v45 = vmul.f32 -1.442695, %v4537_v35  ;;  %v1449_v39 = vadd.f32 %v4456_v20, %v1448_v43  ;;  %v3140_v41 = vpop.f32.mrb[14].mxu0 }
 0x28e   : > { %v3362_v49 = vpop.eup %3361  ;;  %3373 = vpow2.f32 %v2930_v10  ;;  %v1606_v40 = vadd.f32 %v1590_v16, %v1457_v42  ;;  %v1460_v53 = vadd.f32 %v3140_v41, %v4456_v20  ;;  %v1451_v54 = vpop.f32.mrb[15].mxu0 }
 0x28f   : > { %v3364_v58 = vpop.eup %3363  ;;  %v1763_v55 = vadd.f32 1.0, %v3362_v49  ;;  %3375 = vpow2.f32 %v2928_v45  ;;  %v1604_v60 = vadd.f32 %v1588_v32, %v1449_v39  ;;  %v1452_v13 = vadd.f32 %v4456_v20, %v1451_v54 }
 0x290   : > { %v3366_v61 = vpop.eup %3365  ;;  %v1761_v62 = vadd.f32 1.0, %v3364_v58  ;;  %v4554_v47 = vadd.f32 %v1691_v50, %v1606_v40  ;;  %v1607_v0 = vadd.f32 %v1591_v34, %v1460_v53 }
 0x291   : > { %v3368_v17 = vpop.eup %3367  ;;  %3377 = vrcp.f32 %v1763_v55  ;;  %v1764_v3 = vadd.f32 1.0, %v3366_v61  ;;  %v4556_v5 = vadd.f32 %v1689_v26, %v1604_v60  ;;  %v1605_v4 = vadd.f32 %v4487_v38, %v1452_v13 }
 0x292   : > { %3379 = vrcp.f32 %v1761_v62  ;;  %v1762_v8 = vadd.f32 1.0, %v3368_v17  ;;  %v2933_v9 = vmul.f32 -1.442695, %v4554_v47  ;;  %v4560_v22 = vadd.f32 %v1692_v30, %v1607_v0 }
 0x293   : > { %3381 = vrcp.f32 %v1764_v3  ;;  %v2931_v56 = vmul.f32 -1.442695, %v4556_v5  ;;  %v4565_v25 = vadd.f32 %v1690_v12, %v1605_v4  ;;  %v3143_v1 = vpop.f32.mrb[16].mxu0  ;;  %v1595_v30 = vmul.f32 %v4449_v19, %v4513_v24 }
 0x294   : > { %3383 = vrcp.f32 %v1762_v8  ;;  %v2934_v26 = vmul.f32 -1.442695, %v4560_v22  ;;  %v1473_v38 = vadd.f32 %v3143_v1, %v4456_v20  ;;  %v1464_v28 = vpop.f32.mrb[17].mxu0 }
 0x295   : > { %3385 = vpow2.f32 %v2933_v9  ;;  %v2932_v31 = vmul.f32 -1.442695, %v4565_v25  ;;  %v1465_v48 = vadd.f32 %v4456_v20, %v1464_v28  ;;  %v3144_v32 = vpop.f32.mrb[18].mxu0 }
 0x296   : > { %v3370_v16 = vpop.eup %3369  ;;  %3387 = vpow2.f32 %v2931_v56  ;;  %v1610_v34 = vadd.f32 %v1594_v23, %v1473_v38  ;;  %v1476_v29 = vadd.f32 %v3144_v32, %v4456_v20  ;;  %v1467_v36 = vpop.f32.mrb[19].mxu0 }
 0x297   : > { %v3372_v10 = vpop.eup %3371  ;;  %v1767_v42 = vadd.f32 1.0, %v3370_v16  ;;  %3389 = vpow2.f32 %v2934_v26  ;;  %v1608_v43 = vadd.f32 %v1592_v63, %v1465_v48  ;;  %v1468_v12 = vadd.f32 %v4456_v20, %v1467_v36 }
 0x298   : > { %v3374_v19 = vpop.eup %3373  ;;  %v1765_v24 = vadd.f32 1.0, %v3372_v10  ;;  %3391 = vpow2.f32 %v2932_v31  ;;  %v4577_v45 = vadd.f32 %v1695_v15, %v1610_v34  ;;  %v1611_v39 = vadd.f32 %v1595_v30, %v1476_v29 }
 0x299   : > { %v3376_v41 = vpop.eup %3375  ;;  %3393 = vrcp.f32 %v1767_v42  ;;  %v1768_v49 = vadd.f32 1.0, %v3374_v19  ;;  %v4580_v21 = vadd.f32 %v4534_v59, %v1608_v43  ;;  %v1609_v37 = vadd.f32 %v4493_v52, %v1468_v12 }
 0x29a   : > { %3395 = vrcp.f32 %v1765_v24  ;;  %v1766_v50 = vadd.f32 1.0, %v3376_v41  ;;  %v2937_v40 = vmul.f32 -1.442695, %v4577_v45  ;;  %v4585_v20 = vadd.f32 %v4540_v7, %v1611_v39 }
 0x29b   : > { %v3378_v53 = vpop.eup %3377  ;;  %3397 = vrcp.f32 %v1768_v49  ;;  %v2935_v54 = vmul.f32 -1.442695, %v4580_v21  ;;  %v4588_v58 = vadd.f32 %v1694_v18, %v1609_v37 }
 0x29c   : > { %v3380_v55 = vpop.eup %3379  ;;  %3399 = vrcp.f32 %v1766_v50  ;;  %v2938_v59 = vmul.f32 -1.442695, %v4585_v20  ;;  %v1811_v61 = vmul.f32 %v3378_v53, %v4477_v44 }
 0x29d   : > { %v3382_v60 = vpop.eup %3381  ;;  %3401 = vpow2.f32 %v2935_v54  ;;  %v2936_v52 = vmul.f32 -1.442695, %v4588_v58  ;;  %v1809_v63 = vmul.f32 %v3380_v55, %v4481_v46  ;;  %v3337_v54 = vld [vmem:[%s4081_s12 + $0x40] sm:$0xff]  }
 0x29e   : > { %v3384_v13 = vpop.eup %3383  ;;  %v1812_v7 = vmul.f32 %v3382_v60, %v4490_v51  ;;  %3403 = vpow2.f32 %v2937_v40  ;;  %v3338_v55 = vld [vmem:[%s4081_s12] sm:$0xff]   ;;  %3056 = vmatprep.subr.bf16.mxu1 %v3337_v54  ;;  %v3344_v60 = vld [vmem:[%s4081_s12 + $0x18] sm:$0xff]  }
 0x29f   : > { %v3386_v62 = vpop.eup %3385  ;;  %3405 = vpow2.f32 %v2938_v59  ;;  %v1810_v0 = vmul.f32 %v3384_v13, %v4498_v57  ;;  %v3339_v59 = vld [vmem:[%s4081_s12 + $0x48] sm:$0xff]   ;;  %v3346_v13 = vld [vmem:[%s4081_s12 + $0x20] sm:$0xff]  }
 0x2a0   : > { %v3388_v17 = vpop.eup %3387  ;;  %v1771_v3 = vadd.f32 1.0, %v3386_v62  ;;  %3407 = vpow2.f32 %v2936_v52  ;;  %v1826_v4 = vpack.c.bf16 %v1812_v7, %v1811_v61  ;;  %v3345_v52 = vld [vmem:[%s4081_s12 + $0x60] sm:$0xff]   ;;  %v3347_v61 = vld [vmem:[%s4081_s12 + $0x68] sm:$0xff]   ;;  %v3349_v62 = vld [vmem:[%s4081_s12 + $0x70] sm:$0xff]  }
 0x2a1   : > { %v3390_v6 = vpop.eup %3389  ;;  %v1769_v8 = vadd.f32 1.0, %v3388_v17  ;;  %v1825_v9 = vpack.c.bf16 %v1810_v0, %v1809_v63  ;;  %v3348_v7 = vld [vmem:[%s4081_s12 + $0x28] sm:$0xff]   ;;  %v3350_v63 = vld [vmem:[%s4081_s12 + $0x30] sm:$0xff]   ;;  %v4627_v0 = vld [vmem:[%s894_s18] ss:$0 sm:$0xff] }
 0x2a2   : > { %v3392_v23 = vpop.eup %3391  ;;  %3409 = vrcp.f32 %v1771_v3  ;;  %v1772_v56 = vadd.f32 1.0, %v3390_v6 }
 0x2a3   : > { %v3394_v44 = vpop.eup %3393  ;;  %3411 = vrcp.f32 %v1769_v8  ;;  %v1770_v51 = vadd.f32 1.0, %v3392_v23  ;;  %3161 = vmatprep.mubr.bf16.mxu1 %v1825_v9 }
 0x2a4   : > { %v3396_v1 = vpop.eup %3395  ;;  %3413 = vrcp.f32 %v1772_v56  ;;  %3162 = vmatmul.mubr.bf16.vlgmr.msra.gmra.mrb[4].mxu1 %v1826_v4  ;;  %v1815_v26 = vmul.f32 %v3394_v44, %v4517_v27 }
 0x2a5   : > { %v3398_v46 = vpop.eup %3397  ;;  %3415 = vrcp.f32 %v1770_v51  ;;  %v1813_v15 = vmul.f32 %v3396_v1, %v4522_v11  ;;  %3057 = vmatpush3.bf16.msra.mxu1 %v3338_v55 }
 0x2a6   : > { %v3400_v57 = vpop.eup %3399  ;;  %v1816_v38 = vmul.f32 %v3398_v46, %v4529_v33  ;;  %3058 = vmatprep.subr.bf16.mxu1 %v3339_v59 }
 0x2a7   : > { %v3402_v28 = vpop.eup %3401  ;;  %v1814_v30 = vmul.f32 %v3400_v57, %v4537_v35  ;;  %v4645_v57 = vpop.permute.xlu1 %2131 }
 0x2a8   : > { %v3404_v31 = vpop.eup %3403  ;;  %v1773_v48 = vadd.f32 1.0, %v3402_v28  ;;  %v1828_v32 = vpack.c.bf16 %v1816_v38, %v1815_v26 }
 0x2a9   : > { %v3406_v16 = vpop.eup %3405  ;;  %v1775_v18 = vadd.f32 1.0, %v3404_v31  ;;  %v1827_v34 = vpack.c.bf16 %v1814_v30, %v1813_v15 }
 0x2aa   : > { %v3408_v29 = vpop.eup %3407  ;;  %3417 = vrcp.f32 %v1773_v48  ;;  %v1776_v36 = vadd.f32 1.0, %v3406_v16 }
 0x2ab   : > { %3419 = vrcp.f32 %v1775_v18  ;;  %v1774_v10 = vadd.f32 1.0, %v3408_v29  ;;  %3165 = vmatprep.mubr.bf16.mxu1 %v1827_v34  ;;  %v4662_v29 = vpop.permute.xlu1 %2141 }
 0x2ac   : > { %v3410_v27 = vpop.eup %3409  ;;  %3421 = vrcp.f32 %v1776_v36  ;;  %3166 = vmatmul.mubr.bf16.gmra.mrb[8].mxu1 %v1828_v32 }
 0x2ad   : > { %v3412_v33 = vpop.eup %3411  ;;  %3423 = vrcp.f32 %v1774_v10  ;;  %v1819_v35 = vmul.f32 %v3410_v27, %v4554_v47 }
 0x2ae   : > { %v3414_v11 = vpop.eup %3413  ;;  %v1817_v12 = vmul.f32 %v3412_v33, %v4556_v5 }
 0x2af   : > { %v3416_v42 = vpop.eup %3415  ;;  %v1820_v43 = vmul.f32 %v3414_v11, %v4560_v22 }
 0x2b0   : > { %v1818_v19 = vmul.f32 %v3416_v42, %v4565_v25 }
 0x2b1   : > { %v1830_v24 = vpack.c.bf16 %v1820_v43, %v1819_v35 }
 0x2b2   : > { %v1829_v39 = vpack.c.bf16 %v1818_v19, %v1817_v12 }
 0x2b4   : > { %v3418_v41 = vpop.eup %3417  ;;  %3169 = vmatprep.mubr.bf16.mxu1 %v1829_v39 }
 0x2b5   : > { %v3420_v49 = vpop.eup %3419  ;;  %3170 = vmatmul.mubr.bf16.gmra.mrb[12].mxu1 %v1830_v24  ;;  %v1821_v5 = vmul.f32 %v3418_v41, %v4580_v21  ;;  %v3341_v21 = vld [vmem:[%s4081_s12 + $0x50] sm:$0xff]  }
 0x2b6   : > { %v3422_v37 = vpop.eup %3421  ;;  %v1823_v47 = vmul.f32 %v3420_v49, %v4577_v45  ;;  %v3340_v45 = vld [vmem:[%s4081_s12 + $0x8] sm:$0xff]  }
 0x2b7   : > { %v3424_v50 = vpop.eup %3423  ;;  %v1824_v22 = vmul.f32 %v3422_v37, %v4585_v20  ;;  %3059 = vmatpush3.bf16.msra.mxu1 %v3340_v45  ;;  %v3342_v20 = vld [vmem:[%s4081_s12 + $0x10] sm:$0xff]   ;;  %v2147_v37 = vpop.permute.xlu1 %2146 }
 0x2b8   : > { %v1822_v25 = vmul.f32 %v3424_v50, %v4588_v58  ;;  %3060 = vmatprep.subr.bf16.mxu1 %v3341_v21  ;;  %v3343_v58 = vld [vmem:[%s4081_s12 + $0x58] sm:$0xff]  }
 0x2b9   : > { %v1832_v40 = vpack.c.bf16 %v1824_v22, %v1823_v47 }
 0x2ba   : > { %v1831_v53 = vpack.c.bf16 %v1822_v25, %v1821_v5  ;;  %v2137_v5 = vpop.permute.xlu0 %2136 }
 0x2bb   : > { %3061 = vmatpush3.bf16.msra.mxu1 %v3342_v20 }
 0x2bc   : > { %3173 = vmatprep.mubr.bf16.mxu1 %v1831_v53  ;;  %3062 = vmatprep.subr.bf16.mxu1 %v3343_v58 }
 0x2bd   : > { %3174 = vmatmul.mubr.bf16.gmra.mrb[16].mxu1 %v1832_v40 }
 0x2bf   : > { %3063 = vmatpush3.bf16.msra.mxu1 %v3344_v60 }
 0x2c0   : > { %3064 = vmatprep.subr.bf16.mxu1 %v3345_v52  ;;  %v4681_v52 = vpop.permute.xlu1 %2156 }
 0x2c3   : > { %3065 = vmatpush3.bf16.msra.mxu1 %v3346_v13 }
 0x2c4   : > { %3066 = vmatprep.subr.bf16.mxu1 %v3347_v61 }
 0x2c7   : > { %3067 = vmatpush3.bf16.msra.mxu1 %v3348_v7 }
 0x2c8   : > { %3068 = vmatprep.subr.bf16.mxu1 %v3349_v62 }
 0x2cb   : > { %3069 = vmatpush3.bf16.msra.mxu1 %v3350_v63  ;;  %v2152_v63 = vpop.permute.xlu0 %2151 }
 0x377   : > { %v3163_v17 = vpop.f32.mrb[4].mxu1 }
 0x378   : > { %v4630_v3 = vadd.f32 %v3163_v17, %v4627_v0  ;;  %v1938_v4 = vpop.f32.mrb[5].mxu1 }
 0x379   : > { %v4633_v6 = vadd.f32 %v4627_v0, %v1938_v4  ;;  %v3164_v8 = vpop.f32.mrb[6].mxu1 }
 0x37a   : > { %v2950_v9 = vmul.f32 -1.442695, %v4630_v3  ;;  %v4637_v23 = vadd.f32 %v3164_v8, %v4627_v0  ;;  %v1941_v56 = vpop.f32.mrb[7].mxu1 }
 0x37b   : > { %v2948_v44 = vmul.f32 -1.442695, %v4633_v6  ;;  %v4641_v51 = vadd.f32 %v4627_v0, %v1941_v56 }
 0x37c   : > { %3425 = vpow2.f32 %v2950_v9  ;;  %v2951_v1 = vmul.f32 -1.442695, %v4637_v23 }
 0x37d   : > { %3427 = vpow2.f32 %v2948_v44  ;;  %v2949_v46 = vmul.f32 -1.442695, %v4641_v51 }
 0x37e   : > { %3429 = vpow2.f32 %v2951_v1 }
 0x37f   : > { %3431 = vpow2.f32 %v2949_v46  ;;  %v3167_v26 = vpop.f32.mrb[8].mxu1 }
 0x380   : > { %v4648_v38 = vadd.f32 %v3167_v26, %v4627_v0  ;;  %v1954_v28 = vpop.f32.mrb[9].mxu1 }
 0x381   : > { %v4651_v15 = vadd.f32 %v4627_v0, %v1954_v28  ;;  %v3168_v30 = vpop.f32.mrb[10].mxu1 }
 0x382   : > { %v2954_v31 = vmul.f32 -1.442695, %v4648_v38  ;;  %v4655_v48 = vadd.f32 %v3168_v30, %v4627_v0  ;;  %v1957_v32 = vpop.f32.mrb[11].mxu1 }
 0x383   : > { %v2952_v16 = vmul.f32 -1.442695, %v4651_v15  ;;  %v4659_v18 = vadd.f32 %v4627_v0, %v1957_v32 }
 0x384   : > { %3433 = vpow2.f32 %v2954_v31  ;;  %v2955_v34 = vmul.f32 -1.442695, %v4655_v48 }
 0x385   : > { %3435 = vpow2.f32 %v2952_v16  ;;  %v2953_v36 = vmul.f32 -1.442695, %v4659_v18 }
 0x386   : > { %v3426_v10 = vpop.eup %3425  ;;  %3437 = vpow2.f32 %v2955_v34 }
 0x387   : > { %v3428_v27 = vpop.eup %3427  ;;  %v2051_v33 = vadd.f32 1.0, %v3426_v10  ;;  %3439 = vpow2.f32 %v2953_v36 }
 0x388   : > { %v3430_v11 = vpop.eup %3429  ;;  %v2049_v42 = vadd.f32 1.0, %v3428_v27  ;;  %v3171_v35 = vpop.f32.mrb[12].mxu1 }
 0x389   : > { %v3432_v43 = vpop.eup %3431  ;;  %3441 = vrcp.f32 %v2051_v33  ;;  %v2052_v12 = vadd.f32 1.0, %v3430_v11  ;;  %v4666_v19 = vadd.f32 %v3171_v35, %v4627_v0  ;;  %v1970_v24 = vpop.f32.mrb[13].mxu1 }
 0x38a   : > { %3443 = vrcp.f32 %v2049_v42  ;;  %v2050_v39 = vadd.f32 1.0, %v3432_v43  ;;  %v4669_v41 = vadd.f32 %v4627_v0, %v1970_v24  ;;  %v3172_v49 = vpop.f32.mrb[14].mxu1  ;;  %v2167_v11 = vpop.permute.xlu1 %2166 }
 0x38b   : > { %3445 = vrcp.f32 %v2052_v12  ;;  %v2958_v50 = vmul.f32 -1.442695, %v4666_v19  ;;  %v4673_v47 = vadd.f32 %v3172_v49, %v4627_v0  ;;  %v1973_v22 = vpop.f32.mrb[15].mxu1 }
 0x38c   : > { %3447 = vrcp.f32 %v2050_v39  ;;  %v2956_v25 = vmul.f32 -1.442695, %v4669_v41  ;;  %v4677_v40 = vadd.f32 %v4627_v0, %v1973_v22 }
 0x38d   : > { %3449 = vpow2.f32 %v2958_v50  ;;  %v2959_v53 = vmul.f32 -1.442695, %v4673_v47 }
 0x38e   : > { %v3434_v54 = vpop.eup %3433  ;;  %3451 = vpow2.f32 %v2956_v25  ;;  %v2957_v55 = vmul.f32 -1.442695, %v4677_v40 }
 0x38f   : > { %v3436_v59 = vpop.eup %3435  ;;  %v2055_v45 = vadd.f32 1.0, %v3434_v54  ;;  %3453 = vpow2.f32 %v2959_v53  ;;  %v2177_v54 = vpop.permute.xlu1 %2176 }
 0x390   : > { %v3438_v21 = vpop.eup %3437  ;;  %v2053_v20 = vadd.f32 1.0, %v3436_v59  ;;  %3455 = vpow2.f32 %v2957_v55  ;;  %v3175_v58 = vpop.f32.mrb[16].mxu1 }
 0x391   : > { %v3440_v60 = vpop.eup %3439  ;;  %3457 = vrcp.f32 %v2055_v45  ;;  %v2056_v13 = vadd.f32 1.0, %v3438_v21  ;;  %v4684_v61 = vadd.f32 %v3175_v58, %v4627_v0  ;;  %v1986_v7 = vpop.f32.mrb[17].mxu1 }
 0x392   : > { %3459 = vrcp.f32 %v2053_v20  ;;  %v2054_v62 = vadd.f32 1.0, %v3440_v60  ;;  %v4687_v17 = vadd.f32 %v4627_v0, %v1986_v7  ;;  %v3176_v4 = vpop.f32.mrb[18].mxu1 }
 0x393   : > { %v3442_v8 = vpop.eup %3441  ;;  %3461 = vrcp.f32 %v2056_v13  ;;  %v2962_v9 = vmul.f32 -1.442695, %v4684_v61  ;;  %v4691_v56 = vadd.f32 %v3176_v4, %v4627_v0  ;;  %v1989_v44 = vpop.f32.mrb[19].mxu1 }
 0x394   : > { %v3444_v1 = vpop.eup %3443  ;;  %v2099_v46 = vmul.f32 %v3442_v8, %v4630_v3  ;;  %3463 = vrcp.f32 %v2054_v62  ;;  %v2960_v26 = vmul.f32 -1.442695, %v4687_v17  ;;  %v4696_v28 = vadd.f32 %v4627_v0, %v1989_v44  ;;  %v2187_v44 = vpop.permute.xlu1 %2186 }
 0x395   : > { %v3446_v30 = vpop.eup %3445  ;;  %v2097_v31 = vmul.f32 %v3444_v1, %v4633_v6  ;;  %3465 = vpow2.f32 %v2962_v9  ;;  %v2963_v32 = vmul.f32 -1.442695, %v4691_v56  ;;  %v2162_v6 = vpop.permute.xlu0 %2161 }
 0x396   : > { %v3448_v16 = vpop.eup %3447  ;;  %v2100_v34 = vmul.f32 %v3446_v30, %v4637_v23  ;;  %3467 = vpow2.f32 %v2960_v26  ;;  %v2961_v36 = vmul.f32 -1.442695, %v4696_v28  ;;  %v2211_v0 = vmul.f32 %v4662_v29, %v2099_v46 }
 0x397   : > { %v3450_v10 = vpop.eup %3449  ;;  %v2098_v3 = vmul.f32 %v3448_v16, %v4641_v51  ;;  %3469 = vpow2.f32 %v2963_v32  ;;  %v2209_v43 = vmul.f32 %v4645_v57, %v2097_v31 }
 0x398   : > { %v3452_v27 = vpop.eup %3451  ;;  %v2212_v33 = vmul.f32 %v2147_v37, %v2100_v34  ;;  %v2059_v42 = vadd.f32 1.0, %v3450_v10  ;;  %3471 = vpow2.f32 %v2961_v36 }
 0x399   : > { %v3454_v35 = vpop.eup %3453  ;;  %v2210_v12 = vmul.f32 %v2137_v5, %v2098_v3  ;;  %v2057_v23 = vadd.f32 1.0, %v3452_v27  ;;  %v2172_v55 = vpop.permute.xlu0 %2171 }
 0x39a   : > { %v3456_v24 = vpop.eup %3455  ;;  %v2226_v39 = vpack.c.bf16 %v2212_v33, %v2211_v0  ;;  %3473 = vrcp.f32 %v2059_v42  ;;  %v2060_v49 = vadd.f32 1.0, %v3454_v35  ;;  %v2197_v3 = vpop.permute.xlu1 %2196 }
 0x39b   : > { %v3458_v50 = vpop.eup %3457  ;;  %v2225_v51 = vpack.c.bf16 %v2210_v12, %v2209_v43  ;;  %3475 = vrcp.f32 %v2057_v23  ;;  %v2058_v22 = vadd.f32 1.0, %v3456_v24 }
 0x39c   : > { %v3460_v25 = vpop.eup %3459  ;;  %v2103_v29 = vmul.f32 %v3458_v50, %v4648_v38  ;;  %3477 = vrcp.f32 %v2060_v49 }
 0x39d   : > { %v3462_v37 = vpop.eup %3461  ;;  %v2101_v53 = vmul.f32 %v3460_v25, %v4651_v15  ;;  %3479 = vrcp.f32 %v2058_v22  ;;  %3178 = vmatpush3.bf16.msra.mxu0 %v2225_v51  ;;  %v2182_v1 = vpop.permute.xlu0 %2181  ;;  %v3352_v51 = vld [vmem:[%s4081_s12 + $0x38] sm:$0xff]   ;;  %v2289_v22 = vld [vmem:[#allocation12] sm:$0xff] }
 0x39e   : > { %v3464_v57 = vpop.eup %3463  ;;  %v2104_v5 = vmul.f32 %v3462_v37, %v4655_v48  ;;  %3179 = vmatprep.subr.bf16.mxu0 %v3709_v2  ;;  %v2215_v58 = vmul.f32 %v2162_v6, %v2103_v29  ;;  %v2207_v43 = vpop.permute.xlu1 %2206 }
 0x39f   : > { %v3466_v59 = vpop.eup %3465  ;;  %v2102_v45 = vmul.f32 %v3464_v57, %v4659_v18  ;;  %v2213_v13 = vmul.f32 %v2152_v63, %v2101_v53 }
 0x3a0   : > { %v3468_v21 = vpop.eup %3467  ;;  %v2216_v20 = vmul.f32 %v2167_v11, %v2104_v5  ;;  %v2063_v38 = vadd.f32 1.0, %v3466_v59  ;;  %v2298_v5 = vpack.c.bf16 %v2289_v22, %v2289_v22  ;;  %v3353_v59 = vld [vmem:[%s4048_s23] sm:$0xff]  }
 0x3a1   : > { %v3470_v60 = vpop.eup %3469  ;;  %v2214_v15 = vmul.f32 %v4681_v52, %v2102_v45  ;;  %v2061_v7 = vadd.f32 1.0, %v3468_v21  ;;  %3180 = vmatpush3.bf16.msra.mxu0 %v2226_v39  ;;  %v2192_v27 = vpop.permute.xlu0 %2191  ;;  %v3354_v45 = vld [vmem:[%s4048_s23 + $0x8] sm:$0xff]   ;;  %v3355_v21 = vld [vmem:[%s4048_s23 + $0x10] sm:$0xff]  }
 0x3a2   : > { %v3472_v62 = vpop.eup %3471  ;;  %v2228_v4 = vpack.c.bf16 %v2216_v20, %v2215_v58  ;;  %3481 = vrcp.f32 %v2063_v38  ;;  %v2064_v48 = vadd.f32 1.0, %v3470_v60  ;;  %3181 = vmatprep.subr.bf16.mxu0 %v3709_v2  ;;  %v3356_v20 = vld [vmem:[%s4048_s23 + $0x18] sm:$0xff]   ;;  %v3357_v58 = vld [vmem:[%s4048_s23 + $0x20] sm:$0xff]   ;;  %v3358_v38 = vld [vmem:[%s4048_s23 + $0x28] sm:$0xff]  }
 0x3a3   : > { %v2227_v8 = vpack.c.bf16 %v2214_v15, %v2213_v13  ;;  %3483 = vrcp.f32 %v2061_v7  ;;  %v2062_v9 = vadd.f32 1.0, %v3472_v62  ;;  %v3359_v60 = vld [vmem:[%s4048_s23 + $0x30] sm:$0xff]   ;;  %v3360_v13 = vld [vmem:[%s4048_s23 + $0x38] sm:$0xff]   ;;  %v2967_v7 = vld [vmem:[%s902_s24] ss:$0 sm:$0xff]  ;;  %s3714_s24 = smov [#allocation12]  }
 0x3a4   : > { %v3474_v18 = vpop.eup %3473  ;;  %3485 = vrcp.f32 %v2064_v48  ;;  %s2610_s6 = sshll.u32 %s3714_s24, 4  ;;  %s2611_s6 = int_to_ptr.vmem [resolvable:$true] %s2610_s6 }
 0x3a5   : > { %v3476_v46 = vpop.eup %3475  ;;  %v2107_v63 = vmul.f32 %v3474_v18, %v4666_v19  ;;  %3487 = vrcp.f32 %v2062_v9  ;;  %3182 = vmatpush3.bf16.msra.mxu0 %v2227_v8  ;;  %v2202_v12 = vpop.permute.xlu0 %2201  ;;  %s3613_s7 = scalar_lea.vmem %s2611_s6, 128  ;;  %p3620_p13 = scmp.lt.s32.totalorder %s2611_s6, %s2611_s6 }
 0x3a6   : > { %v3478_v52 = vpop.eup %3477  ;;  %v2105_v26 = vmul.f32 %v3476_v46, %v4669_v41  ;;  %3183 = vmatprep.subr.bf16.mxu0 %v3709_v2  ;;  %p3614_p8 = scmp.ne.s32.totalorder %s2611_s6, %s3613_s7  ;;  %p3621_p1 = scmp.lt.s32.totalorder %s3613_s7, %s3613_s7 }
 0x3a7   : > { %v3480_v30 = vpop.eup %3479  ;;  %v2108_v31 = vmul.f32 %v3478_v52, %v4673_v47  ;;  %v2219_v34 = vmul.f32 %v2182_v1, %v2107_v63  ;;  %v2985_v52 = vld [vmem:[%s905_s2] ss:$0 sm:$0xff] }
 0x3a8   : > { %v2106_v32 = vmul.f32 %v3480_v30, %v4677_v40  ;;  %v2217_v36 = vmul.f32 %v2172_v55, %v2105_v26  ;;  %p3615_p0 = pnand %p3614_p8, %p3243_p6  ;;  %p3622_p11 = por %p3621_p1, %p3620_p13 }
 0x3a9   : > { %v2220_v16 = vmul.f32 %v2187_v44, %v2108_v31  ;;  %3184 = vmatpush3.bf16.msra.mxu0 %v2228_v4  ;;  %v2295_v25 = vpop.permute.xlu0 %2294 }
 0x3aa   : > { %v2218_v10 = vmul.f32 %v2177_v54, %v2106_v32  ;;  %3185 = vmatprep.subr.bf16.mxu0 %v3709_v2  ;;  %p3616_p5 = pneg %p3615_p0 }
 0x3ab   : > { %v2230_v19 = vpack.c.bf16 %v2220_v16, %v2219_v34 }
 0x3ac   : > { %v3482_v0 = vpop.eup %3481  ;;  %v2229_v33 = vpack.c.bf16 %v2218_v10, %v2217_v36  ;;  %v2599_v36 = vpop.permute.xlu1 %2598  ;;  %p3623_p2 = pnand %p3622_p11, %p3616_p5 }
 0x3ad   : > { %v3484_v41 = vpop.eup %3483  ;;  %v2111_v11 = vmul.f32 %v3482_v0, %v4684_v61 }
 0x3ae   : > { %v3486_v42 = vpop.eup %3485  ;;  %v2109_v47 = vmul.f32 %v3484_v41, %v4687_v17  ;;  %3186 = vmatpush3.bf16.msra.mxu0 %v2229_v33  ;;  %v2234_v17 = vshrl.u32 %v1131_v14, 7  ;;  %v3351_v14 = vld [vmem:[%s4081_s12 + $0x78] sm:$0xff]  }
 0x3af   : > { %v3488_v40 = vpop.eup %3487  ;;  %v2112_v6 = vmul.f32 %v3486_v42, %v4691_v56  ;;  %3187 = vmatprep.subr.bf16.mxu0 %v3709_v2  ;;  %v2223_v24 = vmul.f32 %v2202_v12, %v2111_v11  ;;  %v2964_v56 = vld [vmem:[%s4874_s9] ss:$0 sm:$0xff]  ;;  %3070 = vmatprep.subr.bf16.mxu1 %v3351_v14 }
 0x3b0   : > { %v2110_v35 = vmul.f32 %v3488_v40, %v4696_v28  ;;  %v2221_v39 = vmul.f32 %v2192_v27, %v2109_v47  ;;  %vm2240_vm7 = vcmp.eq.s32.totalorder %v2234_v17, %v2964_v56  ;;  %v3713_v28 = vmov 1.0|1.0   ;;  %3071 = vmatpush3.bf16.msra.mxu1 %v3352_v51 }
 0x3b1   : > { %v2224_v23 = vmul.f32 %v2207_v43, %v2112_v6  ;;  %vm2965_vm8 = vmpackc.low %vm2240_vm7, %vm2240_vm7 }
 0x3b2   : > { %v2222_v49 = vmul.f32 %v2197_v3, %v2110_v35  ;;  %3188 = vmatpush3.bf16.msra.mxu0 %v2230_v19 }
 0x3b3   : > { %v2232_v61 = vpack.c.bf16 %v2224_v23, %v2223_v24  ;;  %3189 = vmatprep.subr.bf16.mxu0 %v3709_v2 }
 0x3b4   : > { %v2231_v50 = vpack.c.bf16 %v2222_v49, %v2221_v39 }
 0x3b6   : > { %3190 = vmatpush3.bf16.msra.mxu0 %v2231_v50 }
 0x3b7   : > { %3191 = vmatprep.subr.bf16.mxu0 %v3709_v2 }
 0x3ba   : > { %3192 = vmatpush3.bf16.msra.mxu0 %v2232_v61 }
 0x3bb   : > { %3197 = vmatprep.subr.bf16.mxu0 %v3709_v2 }
 0x3bd   : > { %3194 = vmatmul.mubr.msk.bf16.vlgmr.msra.gmra.mrb[20].mxu0 %vm2965_vm8, %v3713_v28 }
 0x3be   : > { %3213 = vmatprep.mubr.msk.bf16.mxu0 %vm3711_vm0, %v3709_v2  ;;  %3198 = vmatpush3.bf16.msra.mxu0 %v3353_v59 }
 0x3bf   : > { %3199 = vmatprep.subr.bf16.mxu0 %v3709_v2 }
 0x3c2   : > { %3200 = vmatpush3.bf16.msra.mxu0 %v3354_v45 }
 0x3c3   : > { %3201 = vmatprep.subr.bf16.mxu0 %v3709_v2 }
 0x3c6   : > { %3202 = vmatpush3.bf16.msra.mxu0 %v3355_v21 }
 0x3c7   : > { %3203 = vmatprep.subr.bf16.mxu0 %v3709_v2 }
 0x3ca   : > { %3204 = vmatpush3.bf16.msra.mxu0 %v3356_v20 }
 0x3cb   : > { %3205 = vmatprep.subr.bf16.mxu0 %v3709_v2 }
 0x3ce   : > { %3206 = vmatpush3.bf16.msra.mxu0 %v3357_v58 }
 0x3cf   : > { %3207 = vmatprep.subr.bf16.mxu0 %v3709_v2 }
 0x3d2   : > { %3208 = vmatpush3.bf16.msra.mxu0 %v3358_v38 }
 0x3d3   : > { %3209 = vmatprep.subr.bf16.mxu0 %v3709_v2 }
 0x3d6   : > { %3210 = vmatpush3.bf16.msra.mxu0 %v3359_v60 }
 0x3d7   : > { %3211 = vmatprep.subr.bf16.mxu0 %v3709_v2 }
 0x3da   : > { %3212 = vmatpush3.bf16.msra.mxu0 %v3360_v13 }
 0x490   : > { %v2278_v29 = vpop.f32.mrb[20].mxu0 }
 0x491   : > { %v2297_v37 = vmul.f32 %v2295_v25, %v2278_v29  ;;  %v3195_v53 = vpop.f32.mrb[21].mxu0 }
 0x492   : > { %v2281_v57 = vpop.f32.mrb[22].mxu0 }
 0x493   : > { %v2299_v54 = vpack.c.bf16 %v2297_v37, %v2297_v37  ;;  %v3196_v55 = vpop.f32.mrb[23].mxu0 }
 0x495   : > { %2467 = vmatprep.mubr.bf16.mxu1 %v2299_v54 }
 0x496   : > { %2468 = vmatmul.mubr.bf16.vlgmr.msra.gmra.mrb[20].mxu1 %v2298_v5 }
 0x569   : > { %v3072_v15 = vpop.f32.mrb[20].mxu1 }
 0x56a   : > { %v3073_v62 = vpop.f32.mrb[21].mxu1 }
 0x56b   : > { %v3074_v4 = vadd.f32 %v3073_v62, %v3072_v15  ;;  %v3075_v48 = vpop.f32.mrb[22].mxu1 }
 0x56c   : > { %v3076_v8 = vpop.f32.mrb[23].mxu1 }
 0x56d   : > { %v2470_v9 = vadd.f32 %v3074_v4, %v2967_v7 }
 0x56f   : > { %v2984_v18 = vmul.f32 -1.442695, %v2470_v9 }
 0x571   : > { %3489 = vpow2.f32 %v2984_v18 }
 0x57b   : > { %v3490_v44 = vpop.eup %3489 }
 0x57c   : > { %v2478_v1 = vadd.f32 1.0, %v3490_v44 }
 0x57e   : > { %3491 = vrcp.f32 %v2478_v1 }
 0x588   : > { %v3492_v2 = vpop.eup %3491 }
 0x589   : > { %v2481_v46 = vmul.f32 %v3492_v2, %v2470_v9 }
 0x58b   : > { %v2482_v63 = vpack.c.bf16 %v2481_v46, %v2481_v46 }
 0x58d   : > { %3214 = vmatmul.mubr.bf16.vlgmr.msra.gmra.mrb[24].mxu0 %v2482_v63 }
 0x660   : > { %v2588_v26 = vpop.f32.mrb[24].mxu0 }
 0x661   : > { %v2589_v30 = vadd.f32 %v2985_v52, %v2588_v26  ;;  %v3215_v31 = vpop.f32.mrb[25].mxu0 }
 0x662   : > { %v2591_v32 = vpop.f32.mrb[26].mxu0 }
 0x663   : > { %v2594_v16 = vadd.f32 %v2589_v30, %v2289_v22  ;;  %v3216_v34 = vpop.f32.mrb[27].mxu0 }
 0x665   : > { %v2601_v10 = vmul.f32 %v2599_v36, %v2594_v16 }
 0x667   : > { %2602 = vst [vmem:[#allocation12] sm:$0xff] %v2601_v10 }
 0x668   : > { %3626 = shalt.err (!%p3623_p2)
}
 0x669   : > { %s4875_s0 = sld [smem:[#allocation33_spill]] }
 0x66f   : > { %s4876_s22 = smov %s4875_s0  ;;  %s3627_s29 = scalar_lea.hbm %s4875_s0, 128 }
 0x670   : > { %p3628_p10 = scmp.ne.s32.totalorder %s4876_s22, %s3627_s29  ;;  %p3633_p7 = scmp.lt.u32.totalorder %s3627_s29, %s4876_s22 }
 0x672   : > { %p3629_p3 = pnand %p3628_p10, %p3243_p6 }
 0x674   : > { %p3630_p12 = pneg %p3629_p3 }
 0x676   : > { %p3635_p9 = pnand %p3633_p7, %p3630_p12 }
 0x678   : > { %3638 = shalt.err (!%p3635_p9)
}
 0x679   : > { %3226 = dma.vmem_to_hbm [thread:$0]  (%p3243_p6), %s2611_s6, 128, %s4876_s22, [#allocation6]  }
 0x67a   : > { %3676 = dma.done.wait (%p3243_p6), [#allocation6], 128  }
 0x67b   : > { %3678 = vsyncadd (%p3243_p6), [#allocation6], 4294967168 }
 0x67c PF: > { %s4877_s12 = sld [smem:[#allocation19_spill]]  ;;  %s4878_s8 = sld [smem:[#allocation17_spill]] }
 0x67d   : > { %s4879_s29 = sld [smem:[#allocation21_spill]]  ;;  %s4880_s30 = sld [smem:[#allocation18_spill]] }
 0x67e   : > { %s4881_s0 = sld [smem:[#allocation20_spill]]  ;;  %s4882_s27 = smov %s3685_s28 }
 0x682   : > { %s38_s19 = sadd.s32 1, %s4877_s12   ;;  %s4883_s28 = smov %s4878_s8 }
 0x683   : > { %p35_p4 = scmp.ge.s32.totalorder %s38_s19, 6  }
 0x685   :  { %37 = sbr.rel (!%p35_p4) target bundleno = 22 (0x16), region = 211 }
 0x68c   :  { %2623 = vsyncpa [#allocation5], 1 }
 0x68d   :  { %2625 = vsyncpa [#allocation5 + $0x1], 1 }
 0x68e   :  { %2626 = vsyncpa [#allocation8], 1 }
 0x68f   :  { %2628 = vsyncpa [#allocation8 + $0x1], 1 }
 0x690   :  { %2629 = vsyncpa [#allocation11], 1 }
 0x691   :  { %2631 = vsyncpa [#allocation11 + $0x1], 1 }
 0x692   :  { %2632 = vsyncpa [#allocation6], 1 }
 0x693   :  { %2634 = vsyncpa [#allocation6 + $0x1], 1 }

</bundles_post_ra>
